<compile_context>
chip_gen: v7x
topology: tpu7x:2x2x1
jax: 0.10.0
libtpu: 0.0.40
codegen_flags: <defaults>
</compile_context>

<pallas_src>
import jax
import jax.numpy as jnp
from jax.experimental import pallas as pl
from jax.experimental.pallas import tpu as pltpu


def _round_up(x, m):
    return ((x + m - 1) // m) * m


def _make_fused_block_kernel(*, Nb, C, K, dil, Wp, HWpad, OFF, inv_n, eps=1e-5):
    taps = [(kh, kw) for kh in range(K) for kw in range(K)]

    def kernel(x_ref, mask_ref, w1_ref, b1_ref, g1_ref, be1_ref,
               w2_ref, b2_ref, g2_ref, be2_ref, o_ref, ypad_ref):
        mask = mask_ref[...]                                  # (1, HWpad) 1.0 on valid px

        def conv(src, w_ref, b_ref):
            # 9 shifted (C,C) x (C,HWpad) matmuls, f32 accumulation (no im2col scratch).
            acc = jnp.zeros((C, HWpad), jnp.float32)
            for t, (kh, kw) in enumerate(taps):
                s = kh * dil * Wp + kw * dil
                acc = acc + jnp.dot(w_ref[t], src[:, s:s + HWpad],
                                    preferred_element_type=jnp.float32)
            return acc + b_ref[...]

        def inorm(z, g, be):
            # One-pass masked stats over the H*W valid pixels (biased var, eps=1e-5).
            zm = z * mask
            s1 = jnp.sum(zm, axis=-1, keepdims=True)
            s2 = jnp.sum(zm * zm, axis=-1, keepdims=True)
            mean = s1 * inv_n
            var = jnp.maximum(s2 * inv_n - mean * mean, 0.0)
            return (z - mean) * jax.lax.rsqrt(var + eps) * g + be

        def elu(y):
            return jnp.where(y > 0, y, jnp.exp(jnp.minimum(y, 0.0)) - 1.0)

        # Zero the re-pad scratch once per grid step; the interior [OFF, OFF+HWpad)
        # is fully rewritten (with mask-zeroed padding columns) for every sample.
        ypad_ref[...] = jnp.zeros_like(ypad_ref)

        for n in range(Nb):                                   # static unroll over samples
            src = x_ref[n]                                    # (C, Lflat) padded flat input

            # ---------------- conv1 -> InstanceNorm -> ELU --------------------------
            z1 = conv(src, w1_ref, b1_ref)
            y1 = elu(inorm(z1, g1_ref[...], be1_ref[...])) * mask
            # TODO(synk): Dropout2d omitted (eval/inference == identity); training-mode
            # channel dropout would use pltpu.prng_seed / pltpu.prng_random_bits here.

            # Re-pad y1 inside VMEM so conv2 reuses the same flat-slice tap machinery.
            ypad_ref[:, OFF:OFF + HWpad] = y1

            # ---------------- conv2 -> InstanceNorm -> +residual -> ELU -------------
            z2 = conv(ypad_ref[...], w2_ref, b2_ref)
            res = src[:, OFF:OFF + HWpad]                     # input residual, wide layout
            out = elu(inorm(z2, g2_ref[...], be2_ref[...]) + res)
            o_ref[n] = out.astype(o_ref.dtype)

    return kernel


def basic_block_2d(x, params, *, kernel_size, padding, dilation, samples_per_step=None):
    """Forward pass of BasicBlock2D.  x: (N, C, H, W) float32."""
    (w1, b1, g1, be1, w2, b2, g2, be2) = params
    N, C, H, W = x.shape
    K, dil = kernel_size, dilation
    pd = padding * dilation
    assert 2 * pd == dil * (K - 1), "residual add requires a 'same' convolution"

    Hp, Wp = H + 2 * pd, W + 2 * pd
    HWw = H * Wp                                  # wide pixel count (valid + per-row junk)
    HWpad = _round_up(HWw, 128)                   # 128-lane-aligned wide width
    OFF = pd * Wp + pd                            # flat offset of pixel (0,0) in padded img
    smax = (K - 1) * dil * Wp + (K - 1) * dil     # largest tap shift
    Lflat = _round_up(max(Hp * Wp, smax + HWpad), 128)

    # ---- samples per grid step: divisor of N, >=2 steps (v7x megacore), VMEM-capped ----
    per_sample_vmem = 2 * C * (Lflat + HWpad) * 4          # double-buffered in+out blocks
    if samples_per_step is None:
        target = max(1, N // 2)
        Nb = 1
        for d in range(1, target + 1):
            if N % d == 0 and d * per_sample_vmem <= (8 << 20):
                Nb = d
    else:
        Nb = samples_per_step
    assert N % Nb == 0
    steps = N // Nb

    # Zero-pad spatially, flatten (lane-dense trailing dim), append zero tail to Lflat.
    xpad = jnp.pad(x, ((0, 0), (0, 0), (pd, pd), (pd, pd)))
    xflat = jnp.pad(xpad.reshape(N, C, Hp * Wp),
                    ((0, 0), (0, 0), (0, Lflat - Hp * Wp))).astype(jnp.float32)

    # Per-tap (C_out, C_in) weight matrices in tap order (kh, kw).
    w1t = jnp.transpose(w1, (2, 3, 0, 1)).reshape(K * K, C, C).astype(jnp.float32)
    w2t = jnp.transpose(w2, (2, 3, 0, 1)).reshape(K * K, C, C).astype(jnp.float32)
    col = lambda v: v.reshape(C, 1).astype(jnp.float32)

    # Valid-pixel mask in the wide layout: col valid iff (col % Wp) < W and col < H*Wp.
    cols = jnp.arange(HWpad, dtype=jnp.int32)
    mask = (((cols % Wp) < W) & (cols < HWw)).astype(jnp.float32).reshape(1, HWpad)

    kernel = _make_fused_block_kernel(Nb=Nb, C=C, K=K, dil=dil, Wp=Wp, HWpad=HWpad,
                                      OFF=OFF, inv_n=1.0 / float(H * W))

    # Shape-derived VMEM budget (blocks double-buffered + scratch + constants + headroom).
    const_bytes = 2 * K * K * C * C * 4 + 8 * C * 4 + HWpad * 4
    est = Nb * per_sample_vmem + C * Lflat * 4 + const_bytes
    vmem_limit = int(min(max(4 * est + (8 << 20), 16 << 20), 64 << 20))

    sample = lambda i: (i, 0, 0)
    const2 = lambda i: (0, 0)
    const3 = lambda i: (0, 0, 0)

    out_wide = pl.pallas_call(
        kernel,
        out_shape=jax.ShapeDtypeStruct((N, C, HWpad), jnp.float32),
        grid=(steps,),
        in_specs=[
            pl.BlockSpec((Nb, C, Lflat), sample),   # padded+flattened input (Nb samples)
            pl.BlockSpec((1, HWpad), const2),       # valid-pixel mask
            pl.BlockSpec((K * K, C, C), const3),    # conv1 per-tap weights
            pl.BlockSpec((C, 1), const2),           # conv1 bias
            pl.BlockSpec((C, 1), const2),           # IN1 gamma
            pl.BlockSpec((C, 1), const2),           # IN1 beta
            pl.BlockSpec((K * K, C, C), const3),    # conv2 per-tap weights
            pl.BlockSpec((C, 1), const2),           # conv2 bias
            pl.BlockSpec((C, 1), const2),           # IN2 gamma
            pl.BlockSpec((C, 1), const2),           # IN2 beta
        ],
        out_specs=pl.BlockSpec((Nb, C, HWpad), sample),
        scratch_shapes=[
            pltpu.VMEM((C, Lflat), jnp.float32),    # re-padded intermediate y1 (reused)
        ],
        compiler_params=pltpu.CompilerParams(
            dimension_semantics=("parallel",),
            vmem_limit_bytes=vmem_limit),
    )(xflat, mask, w1t, col(b1), col(g1), col(be1), w2t, col(b2), col(g2), col(be2))

    # Strip the per-row junk columns and the 128-alignment tail -> (N, C, H, W).
    return out_wide[:, :, :HWw].reshape(N, C, H, Wp)[:, :, :, :W]


def basic_block_2d_reference(x, params, *, kernel_size, padding, dilation):
    """Pure-JAX reference matching PyTorch semantics (eval mode)."""
    (w1, b1, g1, be1, w2, b2, g2, be2) = params
    p = padding * dilation

    def conv(z, w, b):
        y = jax.lax.conv_general_dilated(
            z, w, window_strides=(1, 1), padding=[(p, p), (p, p)],
            rhs_dilation=(dilation, dilation),
            dimension_numbers=("NCHW", "OIHW", "NCHW"))
        return y + b[None, :, None, None]

    def inorm(y, g, be):
        m = jnp.mean(y, axis=(2, 3), keepdims=True)
        v = jnp.mean((y - m) ** 2, axis=(2, 3), keepdims=True)
        yn = (y - m) * jax.lax.rsqrt(v + 1e-5)
        return yn * g[None, :, None, None] + be[None, :, None, None]

    def elu(y):
        return jnp.where(y > 0, y, jnp.exp(jnp.minimum(y, 0.0)) - 1.0)

    out = elu(inorm(conv(x, w1, b1), g1, be1))
    out = inorm(conv(out, w2, b2), g2, be2) + x
    return elu(out)


if __name__ == "__main__":
    N, C, H, W = 2, 4, 16, 16
    KSIZE, PADDING, DILATION = 3, 1, 1
    DROPOUT = 0.1  # eval mode -> identity

    key = jax.random.PRNGKey(0)
    ks = jax.random.split(key, 9)
    scale = 1.0 / float((C * KSIZE * KSIZE) ** 0.5)

    w1 = scale * jax.random.normal(ks[0], (C, C, KSIZE, KSIZE), jnp.float32)
    b1 = 0.1 * jax.random.normal(ks[1], (C,), jnp.float32)
    g1 = 1.0 + 0.1 * jax.random.normal(ks[2], (C,), jnp.float32)
    be1 = 0.1 * jax.random.normal(ks[3], (C,), jnp.float32)
    w2 = scale * jax.random.normal(ks[4], (C, C, KSIZE, KSIZE), jnp.float32)
    b2 = 0.1 * jax.random.normal(ks[5], (C,), jnp.float32)
    g2 = 1.0 + 0.1 * jax.random.normal(ks[6], (C,), jnp.float32)
    be2 = 0.1 * jax.random.normal(ks[7], (C,), jnp.float32)
    params = (w1, b1, g1, be1, w2, b2, g2, be2)

    x = jax.random.normal(ks[8], (N, C, H, W), jnp.float32)

    out = basic_block_2d(x, params, kernel_size=KSIZE, padding=PADDING,
                         dilation=DILATION)
    out = jax.block_until_ready(out)

    ref = basic_block_2d_reference(x, params, kernel_size=KSIZE,
                                   padding=PADDING, dilation=DILATION)
    err = float(jnp.max(jnp.abs(out - ref)))
    assert out.shape == (N, C, H, W)
    assert err < 1e-3, f"max abs error vs reference: {err}"
    print("KERNEL_OK")
</pallas_src>

<mosaic_0001>
module attributes {stable_mosaic.version = 11 : i64} {
  func.func @kernel(%arg0: i32, %arg1: memref<1x4x512xf32, #tpu.memory_space<vmem>>, %arg2: memref<1x384xf32, #tpu.memory_space<vmem>>, %arg3: memref<9x4x4xf32, #tpu.memory_space<vmem>>, %arg4: memref<4x1xf32, #tpu.memory_space<vmem>>, %arg5: memref<4x1xf32, #tpu.memory_space<vmem>>, %arg6: memref<4x1xf32, #tpu.memory_space<vmem>>, %arg7: memref<9x4x4xf32, #tpu.memory_space<vmem>>, %arg8: memref<4x1xf32, #tpu.memory_space<vmem>>, %arg9: memref<4x1xf32, #tpu.memory_space<vmem>>, %arg10: memref<4x1xf32, #tpu.memory_space<vmem>>, %arg11: memref<1x4x384xf32, #tpu.memory_space<vmem>>, %arg12: memref<4x512xf32, #tpu.memory_space<vmem>>) attributes {dimension_semantics = [#tpu.dimension_semantics<parallel>], iteration_bounds = array<i64: 2>, scalar_prefetch = 0 : i64, scratch_operands = 1 : i64, tpu.core_type = #tpu.core_type<tc>, window_params = [{transform_indices = @transform_0, window_bounds = array<i64: 1, 4, 512>}, {pipeline_mode = #tpu.pipeline_mode<synchronous>, transform_indices = @transform_1, window_bounds = array<i64: 1, 384>}, {pipeline_mode = #tpu.pipeline_mode<synchronous>, transform_indices = @transform_2, window_bounds = array<i64: 9, 4, 4>}, {pipeline_mode = #tpu.pipeline_mode<synchronous>, transform_indices = @transform_3, window_bounds = array<i64: 4, 1>}, {pipeline_mode = #tpu.pipeline_mode<synchronous>, transform_indices = @transform_4, window_bounds = array<i64: 4, 1>}, {pipeline_mode = #tpu.pipeline_mode<synchronous>, transform_indices = @transform_5, window_bounds = array<i64: 4, 1>}, {pipeline_mode = #tpu.pipeline_mode<synchronous>, transform_indices = @transform_6, window_bounds = array<i64: 9, 4, 4>}, {pipeline_mode = #tpu.pipeline_mode<synchronous>, transform_indices = @transform_7, window_bounds = array<i64: 4, 1>}, {pipeline_mode = #tpu.pipeline_mode<synchronous>, transform_indices = @transform_8, window_bounds = array<i64: 4, 1>}, {pipeline_mode = #tpu.pipeline_mode<synchronous>, transform_indices = @transform_9, window_bounds = array<i64: 4, 1>}, {transform_indices = @transform_10, window_bounds = array<i64: 1, 4, 384>}]} {
    %c0 = arith.constant 0 : index
    %c0_0 = arith.constant 0 : index
    %0 = vector.load %arg2[%c0, %c0_0] : memref<1x384xf32, #tpu.memory_space<vmem>>, vector<1x384xf32>
    %cst = arith.constant 0.000000e+00 : f32
    %1 = vector.broadcast %cst : f32 to vector<4x512xf32>
    %c0_1 = arith.constant 0 : index
    %c0_2 = arith.constant 0 : index
    %2 = vector.load %arg12[%c0_1, %c0_2] : memref<4x512xf32, #tpu.memory_space<vmem>>, vector<4x512xf32>
    tpu.vector_store %arg12[%c0_1, %c0_2], %1 {strides = array<i32>} : memref<4x512xf32, #tpu.memory_space<vmem>>, vector<4x512xf32>,
    %c0_3 = arith.constant 0 : index
    %c0_4 = arith.constant 0 : index
    %c0_5 = arith.constant 0 : index
    %3 = vector.load %arg1[%c0_3, %c0_4, %c0_5] : memref<1x4x512xf32, #tpu.memory_space<vmem>>, vector<1x4x512xf32>
    %4 = vector.shape_cast %3 : vector<1x4x512xf32> to vector<4x512xf32>
    %cst_6 = arith.constant 0.000000e+00 : f32
    %5 = vector.broadcast %cst_6 : f32 to vector<4x384xf32>
    %c0_7 = arith.constant 0 : index
    %c0_8 = arith.constant 0 : index
    %c0_9 = arith.constant 0 : index
    %6 = vector.load %arg3[%c0_7, %c0_8, %c0_9] : memref<9x4x4xf32, #tpu.memory_space<vmem>>, vector<1x4x4xf32>
    %7 = vector.shape_cast %6 : vector<1x4x4xf32> to vector<4x4xf32>
    %8 = vector.extract_strided_slice %4 {offsets = [0, 0], sizes = [4, 384], strides = [1, 1]} : vector<4x512xf32> to vector<4x384xf32>
    %cst_10 = arith.constant dense<0.000000e+00> : vector<4x384xf32>
    %9 = tpu.matmul %7, %8, %cst_10 {dimension_numbers = #tpu.dot_dimension_numbers<[1], [0], [0], [1], [0, 0, 1, 1], [], []>} : vector<4x4xf32>, vector<4x384xf32>, vector<4x384xf32> -> vector<4x384xf32>
    %10 = arith.addf %5, %9 : vector<4x384xf32>
    %c1 = arith.constant 1 : index
    %c0_11 = arith.constant 0 : index
    %c0_12 = arith.constant 0 : index
    %11 = vector.load %arg3[%c1, %c0_11, %c0_12] : memref<9x4x4xf32, #tpu.memory_space<vmem>>, vector<1x4x4xf32>
    %12 = vector.shape_cast %11 : vector<1x4x4xf32> to vector<4x4xf32>
    %13 = vector.extract_strided_slice %4 {offsets = [0, 1], sizes = [4, 384], strides = [1, 1]} : vector<4x512xf32> to vector<4x384xf32>
    %cst_13 = arith.constant dense<0.000000e+00> : vector<4x384xf32>
    %14 = tpu.matmul %12, %13, %cst_13 {dimension_numbers = #tpu.dot_dimension_numbers<[1], [0], [0], [1], [0, 0, 1, 1], [], []>} : vector<4x4xf32>, vector<4x384xf32>, vector<4x384xf32> -> vector<4x384xf32>
    %15 = arith.addf %10, %14 : vector<4x384xf32>
    %c2 = arith.constant 2 : index
    %c0_14 = arith.constant 0 : index
    %c0_15 = arith.constant 0 : index
    %16 = vector.load %arg3[%c2, %c0_14, %c0_15] : memref<9x4x4xf32, #tpu.memory_space<vmem>>, vector<1x4x4xf32>
    %17 = vector.shape_cast %16 : vector<1x4x4xf32> to vector<4x4xf32>
    %18 = vector.extract_strided_slice %4 {offsets = [0, 2], sizes = [4, 384], strides = [1, 1]} : vector<4x512xf32> to vector<4x384xf32>
    %cst_16 = arith.constant dense<0.000000e+00> : vector<4x384xf32>
    %19 = tpu.matmul %17, %18, %cst_16 {dimension_numbers = #tpu.dot_dimension_numbers<[1], [0], [0], [1], [0, 0, 1, 1], [], []>} : vector<4x4xf32>, vector<4x384xf32>, vector<4x384xf32> -> vector<4x384xf32>
    %20 = arith.addf %15, %19 : vector<4x384xf32>
    %c3 = arith.constant 3 : index
    %c0_17 = arith.constant 0 : index
    %c0_18 = arith.constant 0 : index
    %21 = vector.load %arg3[%c3, %c0_17, %c0_18] : memref<9x4x4xf32, #tpu.memory_space<vmem>>, vector<1x4x4xf32>
    %22 = vector.shape_cast %21 : vector<1x4x4xf32> to vector<4x4xf32>
    %23 = vector.extract_strided_slice %4 {offsets = [0, 18], sizes = [4, 384], strides = [1, 1]} : vector<4x512xf32> to vector<4x384xf32>
    %cst_19 = arith.constant dense<0.000000e+00> : vector<4x384xf32>
    %24 = tpu.matmul %22, %23, %cst_19 {dimension_numbers = #tpu.dot_dimension_numbers<[1], [0], [0], [1], [0, 0, 1, 1], [], []>} : vector<4x4xf32>, vector<4x384xf32>, vector<4x384xf32> -> vector<4x384xf32>
    %25 = arith.addf %20, %24 : vector<4x384xf32>
    %c4 = arith.constant 4 : index
    %c0_20 = arith.constant 0 : index
    %c0_21 = arith.constant 0 : index
    %26 = vector.load %arg3[%c4, %c0_20, %c0_21] : memref<9x4x4xf32, #tpu.memory_space<vmem>>, vector<1x4x4xf32>
    %27 = vector.shape_cast %26 : vector<1x4x4xf32> to vector<4x4xf32>
    %28 = vector.extract_strided_slice %4 {offsets = [0, 19], sizes = [4, 384], strides = [1, 1]} : vector<4x512xf32> to vector<4x384xf32>
    %cst_22 = arith.constant dense<0.000000e+00> : vector<4x384xf32>
    %29 = tpu.matmul %27, %28, %cst_22 {dimension_numbers = #tpu.dot_dimension_numbers<[1], [0], [0], [1], [0, 0, 1, 1], [], []>} : vector<4x4xf32>, vector<4x384xf32>, vector<4x384xf32> -> vector<4x384xf32>
    %30 = arith.addf %25, %29 : vector<4x384xf32>
    %c5 = arith.constant 5 : index
    %c0_23 = arith.constant 0 : index
    %c0_24 = arith.constant 0 : index
    %31 = vector.load %arg3[%c5, %c0_23, %c0_24] : memref<9x4x4xf32, #tpu.memory_space<vmem>>, vector<1x4x4xf32>
    %32 = vector.shape_cast %31 : vector<1x4x4xf32> to vector<4x4xf32>
    %33 = vector.extract_strided_slice %4 {offsets = [0, 20], sizes = [4, 384], strides = [1, 1]} : vector<4x512xf32> to vector<4x384xf32>
    %cst_25 = arith.constant dense<0.000000e+00> : vector<4x384xf32>
    %34 = tpu.matmul %32, %33, %cst_25 {dimension_numbers = #tpu.dot_dimension_numbers<[1], [0], [0], [1], [0, 0, 1, 1], [], []>} : vector<4x4xf32>, vector<4x384xf32>, vector<4x384xf32> -> vector<4x384xf32>
    %35 = arith.addf %30, %34 : vector<4x384xf32>
    %c6 = arith.constant 6 : index
    %c0_26 = arith.constant 0 : index
    %c0_27 = arith.constant 0 : index
    %36 = vector.load %arg3[%c6, %c0_26, %c0_27] : memref<9x4x4xf32, #tpu.memory_space<vmem>>, vector<1x4x4xf32>
    %37 = vector.shape_cast %36 : vector<1x4x4xf32> to vector<4x4xf32>
    %38 = vector.extract_strided_slice %4 {offsets = [0, 36], sizes = [4, 384], strides = [1, 1]} : vector<4x512xf32> to vector<4x384xf32>
    %cst_28 = arith.constant dense<0.000000e+00> : vector<4x384xf32>
    %39 = tpu.matmul %37, %38, %cst_28 {dimension_numbers = #tpu.dot_dimension_numbers<[1], [0], [0], [1], [0, 0, 1, 1], [], []>} : vector<4x4xf32>, vector<4x384xf32>, vector<4x384xf32> -> vector<4x384xf32>
    %40 = arith.addf %35, %39 : vector<4x384xf32>
    %c7 = arith.constant 7 : index
    %c0_29 = arith.constant 0 : index
    %c0_30 = arith.constant 0 : index
    %41 = vector.load %arg3[%c7, %c0_29, %c0_30] : memref<9x4x4xf32, #tpu.memory_space<vmem>>, vector<1x4x4xf32>
    %42 = vector.shape_cast %41 : vector<1x4x4xf32> to vector<4x4xf32>
    %43 = vector.extract_strided_slice %4 {offsets = [0, 37], sizes = [4, 384], strides = [1, 1]} : vector<4x512xf32> to vector<4x384xf32>
    %cst_31 = arith.constant dense<0.000000e+00> : vector<4x384xf32>
    %44 = tpu.matmul %42, %43, %cst_31 {dimension_numbers = #tpu.dot_dimension_numbers<[1], [0], [0], [1], [0, 0, 1, 1], [], []>} : vector<4x4xf32>, vector<4x384xf32>, vector<4x384xf32> -> vector<4x384xf32>
    %45 = arith.addf %40, %44 : vector<4x384xf32>
    %c8 = arith.constant 8 : index
    %c0_32 = arith.constant 0 : index
    %c0_33 = arith.constant 0 : index
    %46 = vector.load %arg3[%c8, %c0_32, %c0_33] : memref<9x4x4xf32, #tpu.memory_space<vmem>>, vector<1x4x4xf32>
    %47 = vector.shape_cast %46 : vector<1x4x4xf32> to vector<4x4xf32>
    %48 = vector.extract_strided_slice %4 {offsets = [0, 38], sizes = [4, 384], strides = [1, 1]} : vector<4x512xf32> to vector<4x384xf32>
    %cst_34 = arith.constant dense<0.000000e+00> : vector<4x384xf32>
    %49 = tpu.matmul %47, %48, %cst_34 {dimension_numbers = #tpu.dot_dimension_numbers<[1], [0], [0], [1], [0, 0, 1, 1], [], []>} : vector<4x4xf32>, vector<4x384xf32>, vector<4x384xf32> -> vector<4x384xf32>
    %50 = arith.addf %45, %49 : vector<4x384xf32>
    %c0_35 = arith.constant 0 : index
    %c0_36 = arith.constant 0 : index
    %51 = vector.load %arg4[%c0_35, %c0_36] : memref<4x1xf32, #tpu.memory_space<vmem>>, vector<4x1xf32>
    %52 = vector.broadcast %51 : vector<4x1xf32> to vector<4x384xf32>
    %53 = arith.addf %50, %52 : vector<4x384xf32>
    %c0_37 = arith.constant 0 : index
    %c0_38 = arith.constant 0 : index
    %54 = vector.load %arg5[%c0_37, %c0_38] : memref<4x1xf32, #tpu.memory_space<vmem>>, vector<4x1xf32>
    %c0_39 = arith.constant 0 : index
    %c0_40 = arith.constant 0 : index
    %55 = vector.load %arg6[%c0_39, %c0_40] : memref<4x1xf32, #tpu.memory_space<vmem>>, vector<4x1xf32>
    %56 = vector.broadcast %0 : vector<1x384xf32> to vector<4x384xf32>
    %57 = arith.mulf %53, %56 : vector<4x384xf32>
    %cst_41 = arith.constant dense<0.000000e+00> : vector<4xf32>
    %58 = vector.multi_reduction <add>, %57, %cst_41 [1] : vector<4x384xf32> to vector<4xf32>
    %59 = vector.shape_cast %58 : vector<4xf32> to vector<4x1xf32>
    %60 = arith.mulf %57, %57 : vector<4x384xf32>
    %cst_42 = arith.constant dense<0.000000e+00> : vector<4xf32>
    %61 = vector.multi_reduction <add>, %60, %cst_42 [1] : vector<4x384xf32> to vector<4xf32>
    %62 = vector.shape_cast %61 : vector<4xf32> to vector<4x1xf32>
    %cst_43 = arith.constant 3.906250e-03 : f32
    %63 = vector.broadcast %cst_43 : f32 to vector<4x1xf32>
    %64 = arith.mulf %59, %63 : vector<4x1xf32>
    %cst_44 = arith.constant 3.906250e-03 : f32
    %65 = vector.broadcast %cst_44 : f32 to vector<4x1xf32>
    %66 = arith.mulf %62, %65 : vector<4x1xf32>
    %67 = arith.mulf %64, %64 : vector<4x1xf32>
    %68 = arith.subf %66, %67 : vector<4x1xf32>
    %cst_45 = arith.constant 0.000000e+00 : f32
    %69 = vector.broadcast %cst_45 : f32 to vector<4x1xf32>
    %70 = arith.maximumf %68, %69 : vector<4x1xf32>
    %71 = vector.broadcast %64 : vector<4x1xf32> to vector<4x384xf32>
    %72 = arith.subf %53, %71 : vector<4x384xf32>
    %cst_46 = arith.constant 9.99999974E-6 : f32
    %73 = vector.broadcast %cst_46 : f32 to vector<4x1xf32>
    %74 = arith.addf %70, %73 : vector<4x1xf32>
    %75 = math.rsqrt %74 : vector<4x1xf32>
    %76 = vector.broadcast %75 : vector<4x1xf32> to vector<4x384xf32>
    %77 = arith.mulf %72, %76 : vector<4x384xf32>
    %78 = vector.broadcast %54 : vector<4x1xf32> to vector<4x384xf32>
    %79 = arith.mulf %77, %78 : vector<4x384xf32>
    %80 = vector.broadcast %55 : vector<4x1xf32> to vector<4x384xf32>
    %81 = arith.addf %79, %80 : vector<4x384xf32>
    %cst_47 = arith.constant 0.000000e+00 : f32
    %82 = vector.broadcast %cst_47 : f32 to vector<4x384xf32>
    %83 = arith.cmpf ogt, %81, %82 : vector<4x384xf32>
    %cst_48 = arith.constant 0.000000e+00 : f32
    %84 = vector.broadcast %cst_48 : f32 to vector<4x384xf32>
    %85 = arith.minimumf %81, %84 : vector<4x384xf32>
    %86 = math.exp %85 : vector<4x384xf32>
    %cst_49 = arith.constant 1.000000e+00 : f32
    %87 = vector.broadcast %cst_49 : f32 to vector<4x384xf32>
    %88 = arith.subf %86, %87 : vector<4x384xf32>
    %89 = arith.select %83, %81, %88 : vector<4x384xi1>, vector<4x384xf32>
    %90 = vector.broadcast %0 : vector<1x384xf32> to vector<4x384xf32>
    %91 = arith.mulf %89, %90 : vector<4x384xf32>
    %c0_50 = arith.constant 0 : index
    %c19 = arith.constant 19 : index
    %92 = vector.load %arg12[%c0_50, %c19] : memref<4x512xf32, #tpu.memory_space<vmem>>, vector<4x384xf32>
    tpu.vector_store %arg12[%c0_50, %c19], %91 {strides = array<i32>} : memref<4x512xf32, #tpu.memory_space<vmem>>, vector<4x384xf32>,
    %c0_51 = arith.constant 0 : index
    %c0_52 = arith.constant 0 : index
    %93 = vector.load %arg12[%c0_51, %c0_52] : memref<4x512xf32, #tpu.memory_space<vmem>>, vector<4x512xf32>
    %cst_53 = arith.constant 0.000000e+00 : f32
    %94 = vector.broadcast %cst_53 : f32 to vector<4x384xf32>
    %c0_54 = arith.constant 0 : index
    %c0_55 = arith.constant 0 : index
    %c0_56 = arith.constant 0 : index
    %95 = vector.load %arg7[%c0_54, %c0_55, %c0_56] : memref<9x4x4xf32, #tpu.memory_space<vmem>>, vector<1x4x4xf32>
    %96 = vector.shape_cast %95 : vector<1x4x4xf32> to vector<4x4xf32>
    %97 = vector.extract_strided_slice %93 {offsets = [0, 0], sizes = [4, 384], strides = [1, 1]} : vector<4x512xf32> to vector<4x384xf32>
    %cst_57 = arith.constant dense<0.000000e+00> : vector<4x384xf32>
    %98 = tpu.matmul %96, %97, %cst_57 {dimension_numbers = #tpu.dot_dimension_numbers<[1], [0], [0], [1], [0, 0, 1, 1], [], []>} : vector<4x4xf32>, vector<4x384xf32>, vector<4x384xf32> -> vector<4x384xf32>
    %99 = arith.addf %94, %98 : vector<4x384xf32>
    %c1_58 = arith.constant 1 : index
    %c0_59 = arith.constant 0 : index
    %c0_60 = arith.constant 0 : index
    %100 = vector.load %arg7[%c1_58, %c0_59, %c0_60] : memref<9x4x4xf32, #tpu.memory_space<vmem>>, vector<1x4x4xf32>
    %101 = vector.shape_cast %100 : vector<1x4x4xf32> to vector<4x4xf32>
    %102 = vector.extract_strided_slice %93 {offsets = [0, 1], sizes = [4, 384], strides = [1, 1]} : vector<4x512xf32> to vector<4x384xf32>
    %cst_61 = arith.constant dense<0.000000e+00> : vector<4x384xf32>
    %103 = tpu.matmul %101, %102, %cst_61 {dimension_numbers = #tpu.dot_dimension_numbers<[1], [0], [0], [1], [0, 0, 1, 1], [], []>} : vector<4x4xf32>, vector<4x384xf32>, vector<4x384xf32> -> vector<4x384xf32>
    %104 = arith.addf %99, %103 : vector<4x384xf32>
    %c2_62 = arith.constant 2 : index
    %c0_63 = arith.constant 0 : index
    %c0_64 = arith.constant 0 : index
    %105 = vector.load %arg7[%c2_62, %c0_63, %c0_64] : memref<9x4x4xf32, #tpu.memory_space<vmem>>, vector<1x4x4xf32>
    %106 = vector.shape_cast %105 : vector<1x4x4xf32> to vector<4x4xf32>
    %107 = vector.extract_strided_slice %93 {offsets = [0, 2], sizes = [4, 384], strides = [1, 1]} : vector<4x512xf32> to vector<4x384xf32>
    %cst_65 = arith.constant dense<0.000000e+00> : vector<4x384xf32>
    %108 = tpu.matmul %106, %107, %cst_65 {dimension_numbers = #tpu.dot_dimension_numbers<[1], [0], [0], [1], [0, 0, 1, 1], [], []>} : vector<4x4xf32>, vector<4x384xf32>, vector<4x384xf32> -> vector<4x384xf32>
    %109 = arith.addf %104, %108 : vector<4x384xf32>
    %c3_66 = arith.constant 3 : index
    %c0_67 = arith.constant 0 : index
    %c0_68 = arith.constant 0 : index
    %110 = vector.load %arg7[%c3_66, %c0_67, %c0_68] : memref<9x4x4xf32, #tpu.memory_space<vmem>>, vector<1x4x4xf32>
    %111 = vector.shape_cast %110 : vector<1x4x4xf32> to vector<4x4xf32>
    %112 = vector.extract_strided_slice %93 {offsets = [0, 18], sizes = [4, 384], strides = [1, 1]} : vector<4x512xf32> to vector<4x384xf32>
    %cst_69 = arith.constant dense<0.000000e+00> : vector<4x384xf32>
    %113 = tpu.matmul %111, %112, %cst_69 {dimension_numbers = #tpu.dot_dimension_numbers<[1], [0], [0], [1], [0, 0, 1, 1], [], []>} : vector<4x4xf32>, vector<4x384xf32>, vector<4x384xf32> -> vector<4x384xf32>
    %114 = arith.addf %109, %113 : vector<4x384xf32>
    %c4_70 = arith.constant 4 : index
    %c0_71 = arith.constant 0 : index
    %c0_72 = arith.constant 0 : index
    %115 = vector.load %arg7[%c4_70, %c0_71, %c0_72] : memref<9x4x4xf32, #tpu.memory_space<vmem>>, vector<1x4x4xf32>
    %116 = vector.shape_cast %115 : vector<1x4x4xf32> to vector<4x4xf32>
    %117 = vector.extract_strided_slice %93 {offsets = [0, 19], sizes = [4, 384], strides = [1, 1]} : vector<4x512xf32> to vector<4x384xf32>
    %cst_73 = arith.constant dense<0.000000e+00> : vector<4x384xf32>
    %118 = tpu.matmul %116, %117, %cst_73 {dimension_numbers = #tpu.dot_dimension_numbers<[1], [0], [0], [1], [0, 0, 1, 1], [], []>} : vector<4x4xf32>, vector<4x384xf32>, vector<4x384xf32> -> vector<4x384xf32>
    %119 = arith.addf %114, %118 : vector<4x384xf32>
    %c5_74 = arith.constant 5 : index
    %c0_75 = arith.constant 0 : index
    %c0_76 = arith.constant 0 : index
    %120 = vector.load %arg7[%c5_74, %c0_75, %c0_76] : memref<9x4x4xf32, #tpu.memory_space<vmem>>, vector<1x4x4xf32>
    %121 = vector.shape_cast %120 : vector<1x4x4xf32> to vector<4x4xf32>
    %122 = vector.extract_strided_slice %93 {offsets = [0, 20], sizes = [4, 384], strides = [1, 1]} : vector<4x512xf32> to vector<4x384xf32>
    %cst_77 = arith.constant dense<0.000000e+00> : vector<4x384xf32>
    %123 = tpu.matmul %121, %122, %cst_77 {dimension_numbers = #tpu.dot_dimension_numbers<[1], [0], [0], [1], [0, 0, 1, 1], [], []>} : vector<4x4xf32>, vector<4x384xf32>, vector<4x384xf32> -> vector<4x384xf32>
    %124 = arith.addf %119, %123 : vector<4x384xf32>
    %c6_78 = arith.constant 6 : index
    %c0_79 = arith.constant 0 : index
    %c0_80 = arith.constant 0 : index
    %125 = vector.load %arg7[%c6_78, %c0_79, %c0_80] : memref<9x4x4xf32, #tpu.memory_space<vmem>>, vector<1x4x4xf32>
    %126 = vector.shape_cast %125 : vector<1x4x4xf32> to vector<4x4xf32>
    %127 = vector.extract_strided_slice %93 {offsets = [0, 36], sizes = [4, 384], strides = [1, 1]} : vector<4x512xf32> to vector<4x384xf32>
    %cst_81 = arith.constant dense<0.000000e+00> : vector<4x384xf32>
    %128 = tpu.matmul %126, %127, %cst_81 {dimension_numbers = #tpu.dot_dimension_numbers<[1], [0], [0], [1], [0, 0, 1, 1], [], []>} : vector<4x4xf32>, vector<4x384xf32>, vector<4x384xf32> -> vector<4x384xf32>
    %129 = arith.addf %124, %128 : vector<4x384xf32>
    %c7_82 = arith.constant 7 : index
    %c0_83 = arith.constant 0 : index
    %c0_84 = arith.constant 0 : index
    %130 = vector.load %arg7[%c7_82, %c0_83, %c0_84] : memref<9x4x4xf32, #tpu.memory_space<vmem>>, vector<1x4x4xf32>
    %131 = vector.shape_cast %130 : vector<1x4x4xf32> to vector<4x4xf32>
    %132 = vector.extract_strided_slice %93 {offsets = [0, 37], sizes = [4, 384], strides = [1, 1]} : vector<4x512xf32> to vector<4x384xf32>
    %cst_85 = arith.constant dense<0.000000e+00> : vector<4x384xf32>
    %133 = tpu.matmul %131, %132, %cst_85 {dimension_numbers = #tpu.dot_dimension_numbers<[1], [0], [0], [1], [0, 0, 1, 1], [], []>} : vector<4x4xf32>, vector<4x384xf32>, vector<4x384xf32> -> vector<4x384xf32>
    %134 = arith.addf %129, %133 : vector<4x384xf32>
    %c8_86 = arith.constant 8 : index
    %c0_87 = arith.constant 0 : index
    %c0_88 = arith.constant 0 : index
    %135 = vector.load %arg7[%c8_86, %c0_87, %c0_88] : memref<9x4x4xf32, #tpu.memory_space<vmem>>, vector<1x4x4xf32>
    %136 = vector.shape_cast %135 : vector<1x4x4xf32> to vector<4x4xf32>
    %137 = vector.extract_strided_slice %93 {offsets = [0, 38], sizes = [4, 384], strides = [1, 1]} : vector<4x512xf32> to vector<4x384xf32>
    %cst_89 = arith.constant dense<0.000000e+00> : vector<4x384xf32>
    %138 = tpu.matmul %136, %137, %cst_89 {dimension_numbers = #tpu.dot_dimension_numbers<[1], [0], [0], [1], [0, 0, 1, 1], [], []>} : vector<4x4xf32>, vector<4x384xf32>, vector<4x384xf32> -> vector<4x384xf32>
    %139 = arith.addf %134, %138 : vector<4x384xf32>
    %c0_90 = arith.constant 0 : index
    %c0_91 = arith.constant 0 : index
    %140 = vector.load %arg8[%c0_90, %c0_91] : memref<4x1xf32, #tpu.memory_space<vmem>>, vector<4x1xf32>
    %141 = vector.broadcast %140 : vector<4x1xf32> to vector<4x384xf32>
    %142 = arith.addf %139, %141 : vector<4x384xf32>
    %143 = vector.extract_strided_slice %4 {offsets = [0, 19], sizes = [4, 384], strides = [1, 1]} : vector<4x512xf32> to vector<4x384xf32>
    %c0_92 = arith.constant 0 : index
    %c0_93 = arith.constant 0 : index
    %144 = vector.load %arg9[%c0_92, %c0_93] : memref<4x1xf32, #tpu.memory_space<vmem>>, vector<4x1xf32>
    %c0_94 = arith.constant 0 : index
    %c0_95 = arith.constant 0 : index
    %145 = vector.load %arg10[%c0_94, %c0_95] : memref<4x1xf32, #tpu.memory_space<vmem>>, vector<4x1xf32>
    %146 = vector.broadcast %0 : vector<1x384xf32> to vector<4x384xf32>
    %147 = arith.mulf %142, %146 : vector<4x384xf32>
    %cst_96 = arith.constant dense<0.000000e+00> : vector<4xf32>
    %148 = vector.multi_reduction <add>, %147, %cst_96 [1] : vector<4x384xf32> to vector<4xf32>
    %149 = vector.shape_cast %148 : vector<4xf32> to vector<4x1xf32>
    %150 = arith.mulf %147, %147 : vector<4x384xf32>
    %cst_97 = arith.constant dense<0.000000e+00> : vector<4xf32>
    %151 = vector.multi_reduction <add>, %150, %cst_97 [1] : vector<4x384xf32> to vector<4xf32>
    %152 = vector.shape_cast %151 : vector<4xf32> to vector<4x1xf32>
    %cst_98 = arith.constant 3.906250e-03 : f32
    %153 = vector.broadcast %cst_98 : f32 to vector<4x1xf32>
    %154 = arith.mulf %149, %153 : vector<4x1xf32>
    %cst_99 = arith.constant 3.906250e-03 : f32
    %155 = vector.broadcast %cst_99 : f32 to vector<4x1xf32>
    %156 = arith.mulf %152, %155 : vector<4x1xf32>
    %157 = arith.mulf %154, %154 : vector<4x1xf32>
    %158 = arith.subf %156, %157 : vector<4x1xf32>
    %cst_100 = arith.constant 0.000000e+00 : f32
    %159 = vector.broadcast %cst_100 : f32 to vector<4x1xf32>
    %160 = arith.maximumf %158, %159 : vector<4x1xf32>
    %161 = vector.broadcast %154 : vector<4x1xf32> to vector<4x384xf32>
    %162 = arith.subf %142, %161 : vector<4x384xf32>
    %cst_101 = arith.constant 9.99999974E-6 : f32
    %163 = vector.broadcast %cst_101 : f32 to vector<4x1xf32>
    %164 = arith.addf %160, %163 : vector<4x1xf32>
    %165 = math.rsqrt %164 : vector<4x1xf32>
    %166 = vector.broadcast %165 : vector<4x1xf32> to vector<4x384xf32>
    %167 = arith.mulf %162, %166 : vector<4x384xf32>
    %168 = vector.broadcast %144 : vector<4x1xf32> to vector<4x384xf32>
    %169 = arith.mulf %167, %168 : vector<4x384xf32>
    %170 = vector.broadcast %145 : vector<4x1xf32> to vector<4x384xf32>
    %171 = arith.addf %169, %170 : vector<4x384xf32>
    %172 = arith.addf %171, %143 : vector<4x384xf32>
    %cst_102 = arith.constant 0.000000e+00 : f32
    %173 = vector.broadcast %cst_102 : f32 to vector<4x384xf32>
    %174 = arith.cmpf ogt, %172, %173 : vector<4x384xf32>
    %cst_103 = arith.constant 0.000000e+00 : f32
    %175 = vector.broadcast %cst_103 : f32 to vector<4x384xf32>
    %176 = arith.minimumf %172, %175 : vector<4x384xf32>
    %177 = math.exp %176 : vector<4x384xf32>
    %cst_104 = arith.constant 1.000000e+00 : f32
    %178 = vector.broadcast %cst_104 : f32 to vector<4x384xf32>
    %179 = arith.subf %177, %178 : vector<4x384xf32>
    %180 = arith.select %174, %172, %179 : vector<4x384xi1>, vector<4x384xf32>
    %c0_105 = arith.constant 0 : index
    %c0_106 = arith.constant 0 : index
    %c0_107 = arith.constant 0 : index
    %181 = vector.load %arg11[%c0_105, %c0_106, %c0_107] : memref<1x4x384xf32, #tpu.memory_space<vmem>>, vector<1x4x384xf32>
    %182 = vector.shape_cast %181 : vector<1x4x384xf32> to vector<4x384xf32>
    %183 = vector.shape_cast %180 : vector<4x384xf32> to vector<1x4x384xf32>
    tpu.vector_store %arg11[%c0_105, %c0_106, %c0_107], %183 {strides = array<i32>} : memref<1x4x384xf32, #tpu.memory_space<vmem>>, vector<1x4x384xf32>,
    return
  }
  func.func @transform_0(%arg0: i32) -> (i32, i32, i32) {
    %c0_i32 = arith.constant 0 : i32
    %c0_i32_0 = arith.constant 0 : i32
    %c0_i32_1 = arith.constant 0 : i32
    return %arg0, %c0_i32, %c0_i32_0 : i32, i32, i32
  }
  func.func @transform_1(%arg0: i32) -> (i32, i32) {
    %c0_i32 = arith.constant 0 : i32
    %c0_i32_0 = arith.constant 0 : i32
    %c0_i32_1 = arith.constant 0 : i32
    return %c0_i32, %c0_i32_0 : i32, i32
  }
  func.func @transform_2(%arg0: i32) -> (i32, i32, i32) {
    %c0_i32 = arith.constant 0 : i32
    %c0_i32_0 = arith.constant 0 : i32
    %c0_i32_1 = arith.constant 0 : i32
    %c0_i32_2 = arith.constant 0 : i32
    return %c0_i32, %c0_i32_0, %c0_i32_1 : i32, i32, i32
  }
  func.func @transform_3(%arg0: i32) -> (i32, i32) {
    %c0_i32 = arith.constant 0 : i32
    %c0_i32_0 = arith.constant 0 : i32
    %c0_i32_1 = arith.constant 0 : i32
    return %c0_i32, %c0_i32_0 : i32, i32
  }
  func.func @transform_4(%arg0: i32) -> (i32, i32) {
    %c0_i32 = arith.constant 0 : i32
    %c0_i32_0 = arith.constant 0 : i32
    %c0_i32_1 = arith.constant 0 : i32
    return %c0_i32, %c0_i32_0 : i32, i32
  }
  func.func @transform_5(%arg0: i32) -> (i32, i32) {
    %c0_i32 = arith.constant 0 : i32
    %c0_i32_0 = arith.constant 0 : i32
    %c0_i32_1 = arith.constant 0 : i32
    return %c0_i32, %c0_i32_0 : i32, i32
  }
  func.func @transform_6(%arg0: i32) -> (i32, i32, i32) {
    %c0_i32 = arith.constant 0 : i32
    %c0_i32_0 = arith.constant 0 : i32
    %c0_i32_1 = arith.constant 0 : i32
    %c0_i32_2 = arith.constant 0 : i32
    return %c0_i32, %c0_i32_0, %c0_i32_1 : i32, i32, i32
  }
  func.func @transform_7(%arg0: i32) -> (i32, i32) {
    %c0_i32 = arith.constant 0 : i32
    %c0_i32_0 = arith.constant 0 : i32
    %c0_i32_1 = arith.constant 0 : i32
    return %c0_i32, %c0_i32_0 : i32, i32
  }
  func.func @transform_8(%arg0: i32) -> (i32, i32) {
    %c0_i32 = arith.constant 0 : i32
    %c0_i32_0 = arith.constant 0 : i32
    %c0_i32_1 = arith.constant 0 : i32
    return %c0_i32, %c0_i32_0 : i32, i32
  }
  func.func @transform_9(%arg0: i32) -> (i32, i32) {
    %c0_i32 = arith.constant 0 : i32
    %c0_i32_0 = arith.constant 0 : i32
    %c0_i32_1 = arith.constant 0 : i32
    return %c0_i32, %c0_i32_0 : i32, i32
  }
  func.func @transform_10(%arg0: i32) -> (i32, i32, i32) {
    %c0_i32 = arith.constant 0 : i32
    %c0_i32_0 = arith.constant 0 : i32
    %c0_i32_1 = arith.constant 0 : i32
    return %arg0, %c0_i32, %c0_i32_0 : i32, i32, i32
  }
}

</mosaic_0001>

<bundles_post_ra>
// kernel: tpu_custom_call.1
= control target key start
LH: loop header
LB: loop body
LE: loop exit
PB: predicated region body
PF: predicated region fallthrough
CT: control target
= control target key end

     0   :  { %15 = vsyncpa [#allocation4], 0  ;;  %s4647_s0 = inlined_call_operand.vmem [shape: f32[2,4,512], index: 0, kind: input, shape index: {}]   ;;  %s4648_s1 = inlined_call_operand.vmem [shape: f32[1,384], index: 1, kind: input, shape index: {}]   ;;  %s4649_s2 = inlined_call_operand.vmem [shape: f32[9,4,4], index: 2, kind: input, shape index: {}]   ;;  %s4650_s3 = inlined_call_operand.vmem [shape: f32[4,1], index: 3, kind: input, shape index: {}]   ;;  %s4651_s4 = inlined_call_operand.vmem [shape: f32[4,1], index: 4, kind: input, shape index: {}]   ;;  %s4652_s5 = inlined_call_operand.vmem [shape: f32[4,1], index: 5, kind: input, shape index: {}]   ;;  %s4653_s6 = inlined_call_operand.vmem [shape: f32[9,4,4], index: 6, kind: input, shape index: {}]   ;;  %s4654_s7 = inlined_call_operand.vmem [shape: f32[4,1], index: 7, kind: input, shape index: {}]   ;;  %s4655_s8 = inlined_call_operand.vmem [shape: f32[4,1], index: 8, kind: input, shape index: {}]   ;;  %s4656_s9 = inlined_call_operand.vmem [shape: f32[4,1], index: 9, kind: input, shape index: {}]   ;;  %s4657_s10 = inlined_call_operand.hbm [shape: f32[2,4,384], index: 10, kind: output, shape index: {}]  }
   0x1   :  { %17 = vsyncpa [#allocation4 + $0x1], 0  ;;  %s4105_s13 = smov 0   ;;  %s4107_s14 = smov 0  }
   0x2   :  { %s4109_s15 = smov 0   ;;  %s4111_s16 = smov 0  }
   0x3 LB: > { %s4126_s17 = sadd.s32 4294967295, %s4035_s16   ;;  %s3619_s18 = sadd.s32 4294967294, %s4035_s16   ;;  %s4035_s16 = sphi %s4111_s16, %s4674_s16   ;;  %s4031_s15 = sphi %s4109_s15, %s4673_s15   ;;  %s4027_s14 = sphi %s4107_s14, %s4672_s14   ;;  %s4023_s13 = sphi %s4105_s13, %s4671_s13  }
   0x4   : > { %s4130_s19 = sadd.s32 1, %s4035_s16   ;;  %s245_s20 = sadd.s32 1, %s4031_s15 }
   0x5   : > { %s242_s21 = ssub.s32 %s4035_s16, %s4130_s19  ;;  %p255_p0 = scmp.ne.s32.totalorder %s4031_s15, %s4027_s14 }
   0x6   : > { %p243_p1 = scmp.eq.s32.totalorder %s242_s21, 0  ;;  %p256_p2 = scmp.eq.s32.totalorder %s4126_s17, 1 }
   0x7   : > { %p261_p3 = scmp.ne.s32.totalorder %s4027_s14, %s4023_s13  ;;  %p262_p4 = scmp.eq.s32.totalorder %s3619_s18, 1 }
   0x8   : > { %s4141_s22 = scalar_select %p243_p1, %s4031_s15, %s245_s20  }
   0x9   : > { %p4143_p5 = por %p256_p2, %p255_p0  ;;  %p4147_p6 = por %p262_p4, %p261_p3 }
   0xa   : > { %p3622_p7 = scmp.ge.s32.totalorder %s4035_s16, 1  ;;  %p315_p8 = scmp.lt.s32.totalorder %s4035_s16, 3 }
   0xc   : > { %p316_p9 = pnand %p3622_p7, %p315_p8 }
   0xd   : > { %p353_p10 = scmp.lt.s32.totalorder (!%p316_p9), %s4126_s17, 1  ;;  %v4037_v0 = vmov (!%p316_p9), 0.0   ;;  %s4038_s30 = smov (!%p316_p9), 127   ;;  %vm4042_vm0 = vmmov (!%p316_p9), 0   ;;  %v4047_v5 = vmov (!%p316_p9), 0   ;;  %vm378_vm1 = vcmask (!%p316_p9), 1039360  }
   0xe   : > { %319 = sbr.rel (%p316_p9) target bundleno = 1369 (0x559), region = 60  ;;  %457 = vmatprep.mubr.f32.mxu0 (!%p316_p9), %v4037_v0  ;;  %359 = vst [vmem:[#allocation2] sm:$0xff] (!%p316_p9), %v4037_v0  ;;  %360 = vst [vmem:[#allocation2 + $0x8] sm:$0xff] (!%p316_p9), %v4037_v0  ;;  %3777 = vmatprep.subr.mxu1 (!%p316_p9), %v4037_v0  ;;  %s4039_s11 = smov (!%p316_p9), 126   ;;  %v1853_v6 = vld [vmem:[%s4650_s3] sm:$0xf] (!%p316_p9) }
   0xf   : > { %s4040_s12 = smov (!%p316_p9), 110   ;;  %s4041_s18 = smov (!%p316_p9), 109   ;;  %3779 = vmatprep.mubr.msk.f32.mxu1 (!%p316_p9), %vm4042_vm0, %v4037_v0  ;;  %3952 = vset.pattern.permute.xlu0 (!%p316_p9), %v4047_v5  ;;  %vm386_vm2 = vcmask (!%p316_p9), 1043456   ;;  %v3625_v12 = vld [vmem:[%s4649_s2 + $0x4] sm:$0xf] (!%p316_p9)  ;;  %vm382_vm3 = vcmask (!%p316_p9), 31744  }
  0x10   : > { %s4043_s20 = smov (!%p316_p9), 108   ;;  %s4044_s21 = smov (!%p316_p9), 92   ;;  %3953 = vset.pattern.permute.xlu1 (!%p316_p9), %v4047_v5  ;;  %vm694_vm4 = vcmask (!%p316_p9), 1031168   ;;  %vm861_vm5 = vcmask (!%p316_p9), 900096   ;;  %v363_v19 = vld [vmem:[%s4649_s2] sm:$0xf] (!%p316_p9) }
  0x11   : > { %vm1028_vm6 = vcmask (!%p316_p9), 891904   ;;  %v3636_v26 = vld [vmem:[%s4649_s2 + $0x8] sm:$0xf] (!%p316_p9)  ;;  %vm1195_vm7 = vcmask (!%p316_p9), 883712   ;;  %v3642_v34 = vld [vmem:[%s4649_s2 + $0xc] sm:$0xf] (!%p316_p9) }
  0x12   : > { %vm1362_vm8 = vcmask (!%p316_p9), 752640   ;;  %v3648_v43 = vld [vmem:[%s4649_s2 + $0x10] sm:$0xf] (!%p316_p9)  ;;  %v3654_v51 = vld [vmem:[%s4649_s2 + $0x14] sm:$0xf] (!%p316_p9)  ;;  %vm4661_vm9 = vcmask (!%p316_p9), 744448  }
  0x13   : > { %v3660_v59 = vld [vmem:[%s4649_s2 + $0x18] sm:$0xf] (!%p316_p9)  ;;  %vm4660_vm10 = vcmask (!%p316_p9), 736256   ;;  %s4048_s28 = smov (!%p316_p9), 19   ;;  %vm1966_vm14 = vcmask (!%p316_p9), 1043608   ;;  %vm1967_vm15 = vcmask (!%p316_p9), 1047556  }
  0x15   : > { %s354_s25 = scalar_select %p353_p10, %s4126_s17, 1 }
  0x17   : > { %s3740_s26 = sshll.u32 %s354_s25, 4  ;;  %s4658_s25 = smov 91  }
  0x18   : > { %s357_s29 = scalar_lea.vmem %s4647_s0, %s3740_s26  ;;  %s4046_s26 = smov 90  }
  0x19   : > { %v4162_v1 = vld [vmem:[%s357_s29] sm:$0xff]  ;;  %v4172_v3 = vld [vmem:[%s357_s29 + $0x8] sm:$0xff]  ;;  %s4664_s29 = smov 91  }
  0x1a   : > { %370 = vrot.lane.b32.xlu1 %v4162_v1, %s4038_s30  ;;  %v4168_v2 = vcombine.high %v4162_v1, %v4162_v1  ;;  %v369_v4 = vcombine.high %v4172_v3, %v4172_v3 }
  0x1c   : > { %372 = vrot.lane.b32.xlu0 %v4168_v2, %s4038_s30 }
  0x1e   : > { %686 = vrot.lane.b32.xlu1 %v4162_v1, %s4039_s11 }
  0x20   : > { %374 = vrot.lane.b32.xlu0 %v4172_v3, %s4038_s30 }
  0x22   : > { %688 = vrot.lane.b32.xlu1 %v4168_v2, %s4039_s11 }
  0x24   : > { %690 = vrot.lane.b32.xlu0 %v4172_v3, %s4039_s11 }
  0x26   : > { %857 = vrot.lane.b32.xlu1 %v4172_v3, %s4040_s12 }
  0x28   : > { %855 = vrot.lane.b32.xlu0 %v4168_v2, %s4040_s12 }
  0x2a   : > { %1022 = vrot.lane.b32.xlu1 %v4168_v2, %s4041_s18 }
  0x2c   : > { %853 = vrot.lane.b32.xlu0 %v4162_v1, %s4040_s12 }
  0x2e   : > { %1020 = vrot.lane.b32.xlu1 %v4162_v1, %s4041_s18 }
  0x30   : > { %1024 = vrot.lane.b32.xlu0 %v4172_v3, %s4041_s18 }
  0x32   : > { %1189 = vrot.lane.b32.xlu1 %v4168_v2, %s4043_s20 }
  0x34   : > { %376 = vrot.lane.b32.xlu0 %v369_v4, %s4038_s30 }
  0x36   : > { %1187 = vrot.lane.b32.xlu1 %v4162_v1, %s4043_s20 }
  0x38   : > { %1191 = vrot.lane.b32.xlu0 %v4172_v3, %s4043_s20 }
  0x3a   : > { %859 = vrot.lane.b32.xlu1 %v369_v4, %s4040_s12 }
  0x3c   : > { %692 = vrot.lane.b32.xlu0 %v369_v4, %s4039_s11 }
  0x3e   : > { %1358 = vrot.lane.b32.xlu1 %v4172_v3, %s4044_s21 }
  0x40   : > { %1356 = vrot.lane.b32.xlu0 %v4168_v2, %s4044_s21 }
  0x42   : > { %1026 = vrot.lane.b32.xlu1 %v369_v4, %s4041_s18 }
  0x44   : > { %1354 = vrot.lane.b32.xlu0 %v4162_v1, %s4044_s21 }
  0x46   : > { %1523 = vrot.lane.b32.xlu1 %v4168_v2, %s4658_s25 }
  0x48   : > { %1193 = vrot.lane.b32.xlu0 %v369_v4, %s4043_s20 }
  0x4a   : > { %1521 = vrot.lane.b32.xlu1 %v4162_v1, %s4658_s25 }
  0x4c   : > { %1525 = vrot.lane.b32.xlu0 %v4172_v3, %s4658_s25 }
  0x4e   : > { %1527 = vrot.lane.b32.xlu1 %v369_v4, %s4658_s25 }
  0x50   : > { %1360 = vrot.lane.b32.xlu0 %v369_v4, %s4044_s21 }
  0x52   : > { %1692 = vrot.lane.b32.xlu1 %v4172_v3, %s4046_s26 }
  0x54   : > { %1690 = vrot.lane.b32.xlu0 %v4168_v2, %s4046_s26 }
  0x56   : > { %1694 = vrot.lane.b32.xlu1 %v369_v4, %s4046_s26 }
  0x58   : > { %1688 = vrot.lane.b32.xlu0 %v4162_v1, %s4046_s26 }
  0x5c   : > { %1856 = vperm.xlu0 %3952, %v1853_v6  }
  0x8c   : > { %v371_v7 = vpop.permute.xlu1 %370 }
  0x8e   : > { %v373_v8 = vpop.permute.xlu0 %372 }
  0x8f   : > { %v379_v14 = vsel %vm378_vm1, %v371_v7, %v373_v8  ;;  %v3672_v7 = vld [vmem:[%s4649_s2 + $0x20] sm:$0xf] }
  0x90   : > { %v687_v9 = vpop.permute.xlu1 %686 }
  0x92   : > { %v375_v10 = vpop.permute.xlu0 %374 }
  0x93   : > { %v380_v11 = vsel %vm378_vm1, %v373_v8, %v375_v10 }
  0x94   : > { %v689_v13 = vpop.permute.xlu1 %688  ;;  %3626 = vmatprep.subr.msk.mxu0 %vm386_vm2, %v380_v11 }
  0x95   : > { %3627 = vmatpush1.msk.msra.mxu0 %vm386_vm2, %v379_v14  ;;  %v695_v20 = vsel %vm694_vm4, %v687_v9, %v689_v13 }
  0x96   : > { %3628 = vmatmul.mubr.msk.f32.vlgmr.msra.gmra.mrb[0].mxu0 %vm382_vm3, %v3625_v12  ;;  %v691_v15 = vpop.permute.xlu0 %690  ;;  %3631 = vmatprep.subr.msk.mxu0 %vm386_vm2, %v4168_v2  ;;  %v3666_v2 = vld [vmem:[%s4649_s2 + $0x1c] sm:$0xf] }
  0x97   : > { %v696_v16 = vsel %vm694_vm4, %v689_v13, %v691_v15  ;;  %3632 = vmatpush1.msk.msra.mxu0 %vm386_vm2, %v4162_v1  ;;  %607 = vmatprep.mubr.f32.mxu0 %v4037_v0 }
  0x98   : > { %v858_v17 = vpop.permute.xlu1 %857  ;;  %3637 = vmatprep.subr.msk.mxu0 %vm386_vm2, %v696_v16 }
  0x9a   : > { %v856_v18 = vpop.permute.xlu0 %855 }
  0x9b   : > { %v863_v22 = vsel %vm861_vm5, %v856_v18, %v858_v17 }
  0x9c   : > { %v1023_v21 = vpop.permute.xlu1 %1022 }
  0x9e   : > { %3633 = vmatmul.mubr.msk.f32.vlgmr.msra.gmra.mrb[0].mxu0 %vm382_vm3, %v363_v19  ;;  %v854_v23 = vpop.permute.xlu0 %853 }
  0x9f   : > { %3638 = vmatpush1.msk.msra.mxu0 %vm386_vm2, %v695_v20  ;;  %771 = vmatprep.mubr.f32.mxu0 %v4037_v0  ;;  %v862_v27 = vsel %vm861_vm5, %v854_v23, %v856_v18 }
  0xa0   : > { %v1021_v24 = vpop.permute.xlu1 %1020  ;;  %3643 = vmatprep.subr.msk.mxu0 %vm386_vm2, %v863_v22 }
  0xa1   : > { %v4284_v37 = vsel %vm1028_vm6, %v1021_v24, %v1023_v21 }
  0xa2   : > { %v1025_v25 = vpop.permute.xlu0 %1024 }
  0xa3   : > { %v4262_v29 = vsel %vm1028_vm6, %v1023_v21, %v1025_v25 }
  0xa4   : > { %v1190_v28 = vpop.permute.xlu1 %1189 }
  0xa6   : > { %3639 = vmatmul.mubr.msk.f32.vlgmr.msra.gmra.mrb[0].mxu0 %vm382_vm3, %v3636_v26  ;;  %v377_v30 = vpop.permute.xlu0 %376 }
  0xa7   : > { %3644 = vmatpush1.msk.msra.mxu0 %vm386_vm2, %v862_v27  ;;  %v381_v31 = vsel %vm378_vm1, %v375_v10, %v377_v30  ;;  %938 = vmatprep.mubr.f32.mxu0 %v4037_v0  ;;  %v1865_v30 = vlaneseq }
  0xa8   : > { %v1188_v32 = vpop.permute.xlu1 %1187  ;;  %3778 = vmatpush3.msk.msra.mxu1 %vm386_vm2, %v381_v31  ;;  %3649 = vmatprep.subr.msk.mxu0 %vm386_vm2, %v4262_v29 }
  0xa9   : > { %3780 = vmatmul.mubr.msk.f32.vlgmr.msra.gmra.mrb[0].mxu1 %vm382_vm3, %v3625_v12  ;;  %3782 = vmatprep.subr.mxu1 %v4037_v0  ;;  %v1196_v47 = vsel %vm1195_vm7, %v1188_v32, %v1190_v28 }
  0xaa   : > { %v1192_v33 = vpop.permute.xlu0 %1191  ;;  %3783 = vmatpush3.msk.msra.mxu1 %vm386_vm2, %v4172_v3  ;;  %3784 = vmatprep.mubr.msk.f32.mxu1 %vm4042_vm0, %v4037_v0 }
  0xab   : > { %3787 = vmatprep.subr.mxu1 %v4037_v0  ;;  %v1197_v36 = vsel %vm1195_vm7, %v1190_v28, %v1192_v33 }
  0xac   : > { %v860_v35 = vpop.permute.xlu1 %859 }
  0xad   : > { %3785 = vmatmul.mubr.msk.f32.vlgmr.msra.gmra.mrb[2].mxu1 %vm382_vm3, %v363_v19  ;;  %v864_v41 = vsel %vm861_vm5, %v858_v17, %v860_v35 }
  0xae   : > { %3645 = vmatmul.mubr.msk.f32.vlgmr.msra.gmra.mrb[0].mxu0 %vm382_vm3, %v3642_v34  ;;  %v693_v38 = vpop.permute.xlu0 %692  ;;  %3789 = vmatprep.mubr.msk.f32.mxu1 %vm4042_vm0, %v4037_v0 }
  0xaf   : > { %3650 = vmatpush1.msk.msra.mxu0 %vm386_vm2, %v4284_v37  ;;  %v697_v39 = vsel %vm694_vm4, %v691_v15, %v693_v38  ;;  %1105 = vmatprep.mubr.f32.mxu0 %v4037_v0 }
  0xb0   : > { %v1359_v40 = vpop.permute.xlu1 %1358  ;;  %3788 = vmatpush3.msk.msra.mxu1 %vm386_vm2, %v697_v39  ;;  %3655 = vmatprep.subr.msk.mxu0 %vm386_vm2, %v1197_v36 }
  0xb1   : > { %3792 = vmatprep.subr.mxu1 %v4037_v0  ;;  %3790 = vmatmul.mubr.msk.f32.vlgmr.msra.gmra.mrb[4].mxu1 %vm382_vm3, %v3636_v26 }
  0xb2   : > { %3793 = vmatpush3.msk.msra.mxu1 %vm386_vm2, %v864_v41  ;;  %v1357_v42 = vpop.permute.xlu0 %1356  ;;  %3794 = vmatprep.mubr.msk.f32.mxu1 %vm4042_vm0, %v4037_v0  ;;  %v358_v41 = vld [vmem:[%s4648_s1] sm:$0x7] }
  0xb3   : > { %3797 = vmatprep.subr.mxu1 %v4037_v0  ;;  %v1364_v45 = vsel %vm1362_vm8, %v1357_v42, %v1359_v40 }
  0xb4   : > { %v1027_v44 = vpop.permute.xlu1 %1026 }
  0xb5   : > { %v4307_v46 = vsel %vm1028_vm6, %v1025_v25, %v1027_v44  ;;  %3795 = vmatmul.mubr.msk.f32.vlgmr.msra.gmra.mrb[6].mxu1 %vm382_vm3, %v3642_v34  ;;  %v1866_v34 = vshrl.u32 %v1865_v30, 7 }
  0xb6   : > { %3651 = vmatmul.mubr.msk.f32.vlgmr.msra.gmra.mrb[0].mxu0 %vm382_vm3, %v3648_v43  ;;  %3798 = vmatpush3.msk.msra.mxu1 %vm386_vm2, %v4307_v46  ;;  %v1355_v48 = vpop.permute.xlu0 %1354 }
  0xb7   : > { %3656 = vmatpush1.msk.msra.mxu0 %vm386_vm2, %v1196_v47  ;;  %3799 = vmatprep.mubr.msk.f32.mxu1 %vm4042_vm0, %v4037_v0  ;;  %v1363_v53 = vsel %vm1362_vm8, %v1355_v48, %v1357_v42  ;;  %v1875_v39 = vsub.s32 2, %v1866_v34  ;;  %v1867_v42 = vsub.s32 0, %v1866_v34 }
  0xb8   : > { %3661 = vmatprep.subr.msk.mxu0 %vm386_vm2, %v1364_v45  ;;  %v1524_v49 = vpop.permute.xlu1 %1523  ;;  %3802 = vmatprep.subr.mxu1 %v4037_v0 }
  0xb9   : > { %3800 = vmatmul.mubr.msk.f32.vlgmr.msra.gmra.mrb[8].mxu1 %vm382_vm3, %v3648_v43  ;;  %1272 = vmatprep.mubr.f32.mxu0 %v4037_v0  ;;  %v1871_v43 = vsub.s32 1, %v1866_v34  ;;  %v4380_v45 = vrot.slane %v358_v41, %v1875_v39  ;;  %v4382_v47 = vrot.slane %v358_v41, %v1867_v42 }
  0xba   : > { %v1194_v50 = vpop.permute.xlu0 %1193  ;;  %3804 = vmatprep.mubr.msk.f32.mxu1 %vm4042_vm0, %v4037_v0 }
  0xbb   : > { %v1198_v52 = vsel %vm1195_vm7, %v1192_v33, %v1194_v50 }
  0xbc   : > { %3803 = vmatpush3.msk.msra.mxu1 %vm386_vm2, %v1198_v52  ;;  %v1522_v54 = vpop.permute.xlu1 %1521 }
  0xbd   : > { %3805 = vmatmul.mubr.msk.f32.vlgmr.msra.gmra.mrb[10].mxu1 %vm382_vm3, %v3654_v51  ;;  %3807 = vmatprep.subr.mxu1 %v4037_v0  ;;  %v1530_v62 = vsel %vm4661_vm9, %v1522_v54, %v1524_v49 }
  0xbe   : > { %3657 = vmatmul.mubr.msk.f32.vlgmr.msra.gmra.mrb[0].mxu0 %vm382_vm3, %v3654_v51  ;;  %v1526_v55 = vpop.permute.xlu0 %1525  ;;  %3809 = vmatprep.mubr.msk.f32.mxu1 %vm4042_vm0, %v4037_v0 }
  0xbf   : > { %3662 = vmatpush1.msk.msra.mxu0 %vm386_vm2, %v1363_v53  ;;  %v1531_v56 = vsel %vm4661_vm9, %v1524_v49, %v1526_v55  ;;  %1439 = vmatprep.mubr.f32.mxu0 %v4037_v0  ;;  %v4384_v49 = vrot.slane %v358_v41, %v1871_v43 }
  0xc0   : > { %v1528_v57 = vpop.permute.xlu1 %1527  ;;  %3667 = vmatprep.subr.msk.mxu0 %vm386_vm2, %v1531_v56 }
  0xc1   : > { %v1532_v60 = vsel %vm4661_vm9, %v1526_v55, %v1528_v57  ;;  %vm1968_vm9 = vmor %vm1967_vm15, %vm1966_vm14 }
  0xc2   : > { %v1361_v58 = vpop.permute.xlu0 %1360 }
  0xc3   : > { %v1365_v61 = vsel %vm1362_vm8, %v1359_v40, %v1361_v58 }
  0xc4   : > { %3808 = vmatpush3.msk.msra.mxu1 %vm386_vm2, %v1365_v61  ;;  %v1693_v63 = vpop.permute.xlu1 %1692 }
  0xc5   : > { %3810 = vmatmul.mubr.msk.f32.vlgmr.msra.gmra.mrb[12].mxu1 %vm382_vm3, %v3660_v59  ;;  %3812 = vmatprep.subr.mxu1 %v4037_v0 }
  0xc6   : > { %3663 = vmatmul.mubr.msk.f32.vlgmr.msra.gmra.mrb[0].mxu0 %vm382_vm3, %v3660_v59  ;;  %3813 = vmatpush3.msk.msra.mxu1 %vm386_vm2, %v1532_v60  ;;  %v1691_v1 = vpop.permute.xlu0 %1690 }
  0xc7   : > { %3668 = vmatpush1.msk.msra.mxu0 %vm386_vm2, %v1530_v62  ;;  %v1698_v3 = vsel %vm4660_vm10, %v1691_v1, %v1693_v63  ;;  %3814 = vmatprep.mubr.msk.f32.mxu1 %vm4042_vm0, %v4037_v0 }
  0xc8   : > { %v1695_v4 = vpop.permute.xlu1 %1694  ;;  %3817 = vmatprep.subr.mxu1 %v4037_v0  ;;  %1606 = vmatprep.mubr.f32.mxu0 %v4037_v0 }
  0xc9   : > { %3815 = vmatmul.mubr.msk.f32.vlgmr.msra.gmra.mrb[14].mxu1 %vm382_vm3, %v3666_v2  ;;  %v1699_v5 = vsel %vm4660_vm10, %v1693_v63, %v1695_v4  ;;  %3673 = vmatprep.subr.msk.mxu0 %vm386_vm2, %v1698_v3 }
  0xca   : > { %v1689_v6 = vpop.permute.xlu0 %1688  ;;  %3818 = vmatpush3.msk.msra.mxu1 %vm386_vm2, %v1699_v5  ;;  %3819 = vmatprep.mubr.msk.f32.mxu1 %vm4042_vm0, %v4037_v0 }
  0xcb   : > { %3822 = vmatprep.subr.mxu1 %v4037_v0  ;;  %v1697_v8 = vsel %vm4660_vm10, %v1689_v6, %v1691_v1  ;;  %v1862_v6 = vld [vmem:[%s4651_s4] sm:$0xf]  ;;  %vm1960_vm10 = vcmask 154624  }
  0xcd   : > { %3820 = vmatmul.mubr.msk.f32.vlgmr.msra.gmra.mrb[16].mxu1 %vm382_vm3, %v3672_v7 }
  0xce   : > { %3669 = vmatmul.mubr.msk.f32.vlgmr.msra.gmra.mrb[0].mxu0 %vm382_vm3, %v3666_v2  ;;  %3824 = vmatprep.mubr.msk.f32.mxu1 %vm4042_vm0, %v4037_v0 }
  0xcf   : > { %3674 = vmatpush1.msk.msra.mxu0 %vm386_vm2, %v1697_v8  ;;  %1773 = vmatprep.mubr.f32.mxu0 %v4037_v0 }
  0xd6   : > { %3675 = vmatmul.mubr.msk.f32.vlgmr.msra.gmra.mrb[0].mxu0 %vm382_vm3, %v3672_v7  ;;  %v1863_v7 = vld [vmem:[%s4652_s5] sm:$0xf] }
  0xd7   : > { %2066 = vmatprep.mubr.f32.mxu0 %v4037_v0 }
  0xdb   : > { %v1857_v40 = vpop.permute.xlu0 %1856 }
 0x17c   : > { %v530_v9 = vpop.f32.mrb[0].mxu1 }
 0x17d   : > { %v3781_v10 = vpop.f32.mrb[1].mxu1 }
 0x180   : > { %v680_v11 = vpop.f32.mrb[2].mxu1 }
 0x181   : > { %v681_v12 = vadd.f32 %v680_v11, %v530_v9  ;;  %v3786_v13 = vpop.f32.mrb[3].mxu1 }
 0x184   : > { %v844_v14 = vpop.f32.mrb[4].mxu1 }
 0x185   : > { %v850_v15 = vadd.f32 %v844_v14, %v681_v12  ;;  %v3791_v16 = vpop.f32.mrb[5].mxu1 }
 0x188   : > { %v1011_v17 = vpop.f32.mrb[6].mxu1 }
 0x189   : > { %v1017_v18 = vadd.f32 %v1011_v17, %v850_v15  ;;  %v3796_v19 = vpop.f32.mrb[7].mxu1 }
 0x18c   : > { %v1178_v20 = vpop.f32.mrb[8].mxu1 }
 0x18d   : > { %v1184_v21 = vadd.f32 %v1178_v20, %v1017_v18  ;;  %v3801_v22 = vpop.f32.mrb[9].mxu1 }
 0x190   : > { %v1345_v23 = vpop.f32.mrb[10].mxu1 }
 0x191   : > { %v1351_v24 = vadd.f32 %v1345_v23, %v1184_v21  ;;  %v3806_v25 = vpop.f32.mrb[11].mxu1 }
 0x198   : > { %v1512_v26 = vpop.f32.mrb[12].mxu1 }
 0x199   : > { %v1518_v27 = vadd.f32 %v1512_v26, %v1351_v24  ;;  %v3811_v28 = vpop.f32.mrb[13].mxu1 }
 0x19c   : > { %v1679_v31 = vpop.f32.mrb[14].mxu1 }
 0x19d   : > { %v1685_v32 = vadd.f32 %v1679_v31, %v1518_v27  ;;  %v3816_v33 = vpop.f32.mrb[15].mxu1 }
 0x1a0   : > { %v1846_v35 = vpop.f32.mrb[16].mxu1 }
 0x1a1   : > { %v1852_v36 = vadd.f32 %v1846_v35, %v1685_v32  ;;  %v3821_v38 = vpop.f32.mrb[17].mxu1 }
 0x1a3   : > { %v1861_v44 = vadd.f32 %v1857_v40, %v1852_v36 }
 0x1a5   : > { %v1882_v53 = vmul.f32 %v4380_v45, %v1861_v44 }
 0x1a7   : > { %v1892_v60 = vmul.f32 %v1882_v53, %v1882_v53  ;;  %v1886_v63 = vsel %vm386_vm2, %v1882_v53, 0.0 }
 0x1a9   : > { %v1775_v48 = vpop.f32.mrb[0].mxu0  ;;  %v1896_v4 = vsel %vm386_vm2, %v1892_v60, 0.0 }
 0x1aa   : > { %v1859_v50 = vadd.f32 %v1857_v40, %v1775_v48  ;;  %v1777_v51 = vpop.f32.mrb[1].mxu0 }
 0x1ab   : > { %v1860_v52 = vadd.f32 %v1857_v40, %v1777_v51 }
 0x1ac   : > { %v1880_v54 = vmul.f32 %v4382_v47, %v1859_v50 }
 0x1ad   : > { %v1881_v55 = vmul.f32 %v4384_v49, %v1860_v52 }
 0x1ae   : > { %v1890_v56 = vmul.f32 %v1880_v54, %v1880_v54  ;;  %v1883_v57 = vsel %vm386_vm2, %v1880_v54, 0.0 }
 0x1af   : > { %v1891_v58 = vmul.f32 %v1881_v55, %v1881_v55  ;;  %v1884_v59 = vsel %vm386_vm2, %v1881_v55, 0.0 }
 0x1b0   : > { %v1885_v61 = vadd.f32 %v1884_v59, %v1883_v57  ;;  %v1893_v62 = vsel %vm386_vm2, %v1890_v56, 0.0 }
 0x1b1   : > { %v1894_v1 = vsel %vm386_vm2, %v1891_v58, 0.0 }
 0x1b2   : > { %v1887_v2 = vadd.f32 %v1886_v63, %v1885_v61  ;;  %v1895_v3 = vadd.f32 %v1894_v1, %v1893_v62 }
 0x1b4   : > { %1888 = vadd.xlane.f32.xlu1 %v1887_v2  ;;  %v1897_v5 = vadd.f32 %v1896_v4, %v1895_v3  ;;  %v3455_v4 = vld [vmem:[%s4654_s7] sm:$0xf] }
 0x1b6   : > { %1898 = vadd.xlane.f32.xlu0 %v1897_v5 }
 0x1c5   : > { %1915 = vperm.xlu1 %3953, %v1862_v6  }
 0x1cc   : > { %1923 = vperm.xlu0 %3952, %v1863_v7  }
 0x241   : > { %v1889_v8 = vpop.xlane.xlu1 %1888 }
 0x242   : > { %v1900_v9 = vmul.f32 0.00390625, %v1889_v8 }
 0x243   : > { %v1899_v10 = vpop.xlane.xlu0 %1898 }
 0x244   : > { %v1901_v11 = vmul.f32 0.00390625, %v1899_v10  ;;  %v1902_v12 = vmul.f32 %v1900_v9, %v1900_v9  ;;  %v1905_v16 = vsub.f32 %v1859_v50, %v1900_v9  ;;  %v1906_v17 = vsub.f32 %v1860_v52, %v1900_v9 }
 0x245   : > { %v1907_v18 = vsub.f32 %v1861_v44, %v1900_v9  ;;  %v1916_v20 = vpop.permute.xlu1 %1915  ;;  %v3681_v9 = vld [vmem:[%s4653_s6 + $0x4] sm:$0xf] }
 0x246   : > { %v1903_v13 = vsub.f32 %v1901_v11, %v1902_v12 }
 0x248   : > { %v1904_v14 = vmax.f32 %v1903_v13, 0.0 }
 0x24a   : > { %v1908_v15 = vadd.f32 1e-05, %v1904_v14 }
 0x24b   : > { %v1924_v27 = vpop.permute.xlu0 %1923 }
 0x24c   : > { %3957 = vrsqrt.f32 %v1908_v15 }
 0x256   : > { %v3958_v19 = vpop.eup %3957 }
 0x257   : > { %v1910_v21 = vmul.f32 %v3958_v19, %v1905_v16  ;;  %v1911_v22 = vmul.f32 %v3958_v19, %v1906_v17  ;;  %v1912_v23 = vmul.f32 %v3958_v19, %v1907_v18  ;;  %v1975_v16 = vld [vmem:[%s4653_s6] sm:$0xf] }
 0x259   : > { %v1918_v24 = vmul.f32 %v1916_v20, %v1910_v21  ;;  %v1919_v25 = vmul.f32 %v1916_v20, %v1911_v22  ;;  %v1920_v26 = vmul.f32 %v1916_v20, %v1912_v23  ;;  %v3692_v23 = vld [vmem:[%s4653_s6 + $0x8] sm:$0xf] }
 0x25b   : > { %v1926_v28 = vadd.f32 %v1924_v27, %v1918_v24  ;;  %v1927_v30 = vadd.f32 %v1924_v27, %v1919_v25  ;;  %v1928_v31 = vadd.f32 %v1924_v27, %v1920_v26 }
 0x25d   : > { %v1932_v32 = vmin.f32 %v1926_v28, 0.0  ;;  %v1933_v33 = vmin.f32 %v1927_v30, 0.0  ;;  %v1934_v34 = vmin.f32 %v1928_v31, 0.0  ;;  %vm1929_vm11 = vcmp.gt.f32.partialorder %v1926_v28, 0.0 }
 0x25e   : > { %vm1930_vm12 = vcmp.gt.f32.partialorder %v1927_v30, 0.0  ;;  %vm1931_vm13 = vcmp.gt.f32.partialorder %v1928_v31, 0.0 }
 0x25f   : > { %v1935_v35 = vmul.f32 1.442695, %v1932_v32  ;;  %v1937_v36 = vmul.f32 1.442695, %v1933_v33  ;;  %v1939_v38 = vmul.f32 1.442695, %v1934_v34 }
 0x261   : > { %3959 = vpow2.f32 %v1935_v35 }
 0x262   : > { %3961 = vpow2.f32 %v1937_v36 }
 0x263   : > { %3963 = vpow2.f32 %v1939_v38 }
 0x26b   : > { %v3960_v39 = vpop.eup %3959 }
 0x26c   : > { %v3962_v40 = vpop.eup %3961  ;;  %v3678_v41 = vadd.f32 -1.0, %v3960_v39 }
 0x26d   : > { %v3964_v42 = vpop.eup %3963  ;;  %v3679_v43 = vadd.f32 -1.0, %v3962_v40  ;;  %v3704_v40 = vld [vmem:[%s4653_s6 + $0x10] sm:$0xf] }
 0x26e   : > { %v1944_v44 = vsel %vm1929_vm11, %v1926_v28, %v3678_v41  ;;  %v3680_v51 = vadd.f32 -1.0, %v3964_v42  ;;  %vm1970_vm11 = vcmask 154628  }
 0x26f   : > { %v1945_v48 = vsel %vm1930_vm12, %v1927_v30, %v3679_v43  ;;  %v1947_v50 = vmul.f32 %v1944_v44, %v4382_v47  ;;  %vm1971_vm12 = vmor %vm1970_vm11, %vm386_vm2 }
 0x270   : > { %v1948_v52 = vmul.f32 %v1945_v48, %v4384_v49  ;;  %v1946_v54 = vsel %vm1931_vm13, %v1928_v31, %v3680_v51  ;;  %v3698_v31 = vld [vmem:[%s4653_s6 + $0xc] sm:$0xf] }
 0x271   : > { %v1949_v55 = vmul.f32 %v1946_v54, %v4380_v45 }
 0x272   : > { %v1953_v53 = vcombine.low %v1947_v50, %v1948_v52 }
 0x274   : > { %1954 = vrot.lane.b32.xlu1 %v1953_v53, %s4048_s28  ;;  %v3710_v53 = vld [vmem:[%s4653_s6 + $0x14] sm:$0xf] }
 0x278   : > { %1956 = vrot.lane.b32.xlu1 %v1949_v55, %s4048_s28 }
 0x2e6   : > { %v1955_v56 = vpop.permute.xlu1 %1954 }
 0x2e7   : > { %v1958_v57 = vrot.slane %v1955_v56, 4 }
 0x2e9   : > { %v1961_v58 = vsel %vm1960_vm10, %v1958_v57, %v1955_v56 }
 0x2ea   : > { %1969 = vst.msk [vmem:[#allocation2] sm:$0xff] %vm1968_vm9, %v1961_v58  ;;  %v1957_v59 = vpop.permute.xlu1 %1956 }
 0x2eb   : > { %v1959_v60 = vrot.slane %v1957_v59, 4 }
 0x2ed   : > { %v1962_v61 = vsel %vm386_vm2, %v1958_v57, %v1959_v60 }
 0x2ee   : > { %v1963_v62 = vsel %vm1960_vm10, %v1962_v61, %v1957_v59 }
 0x2ef   : > { %1972 = vst.msk [vmem:[#allocation2 + $0x8] sm:$0xff] %vm1971_vm12, %v1963_v62  ;;  %v3716_v62 = vld [vmem:[%s4653_s6 + $0x18] sm:$0xf] }
 0x2f1   : > { %v1973_v63 = vld [vmem:[#allocation2] sm:$0xff] }
 0x2f2   : > { %v1980_v1 = vcombine.high %v1973_v63, %v1973_v63 }
 0x2f4   : > { %1984 = vrot.lane.b32.xlu0 %v1980_v1, %s4038_s30 }
 0x2f6   : > { %v4407_v2 = vld [vmem:[#allocation2 + $0x8] sm:$0xff] }
 0x2f7   : > { %1986 = vrot.lane.b32.xlu1 %v4407_v2, %s4038_s30  ;;  %v1981_v3 = vcombine.high %v4407_v2, %v4407_v2 }
 0x2f8   : > { %1982 = vrot.lane.b32.xlu0 %v1973_v63, %s4038_s30 }
 0x2fb   : > { %2295 = vrot.lane.b32.xlu1 %v1973_v63, %s4039_s11 }
 0x2fc   : > { %2299 = vrot.lane.b32.xlu0 %v4407_v2, %s4039_s11 }
 0x2ff   : > { %2297 = vrot.lane.b32.xlu1 %v1980_v1, %s4039_s11 }
 0x300   : > { %2461 = vrot.lane.b32.xlu0 %v1973_v63, %s4040_s12 }
 0x303   : > { %2465 = vrot.lane.b32.xlu1 %v4407_v2, %s4040_s12 }
 0x304   : > { %2463 = vrot.lane.b32.xlu0 %v1980_v1, %s4040_s12 }
 0x307   : > { %2627 = vrot.lane.b32.xlu1 %v1973_v63, %s4041_s18 }
 0x308   : > { %2631 = vrot.lane.b32.xlu0 %v4407_v2, %s4041_s18 }
 0x30b   : > { %2793 = vrot.lane.b32.xlu1 %v1973_v63, %s4043_s20 }
 0x30c   : > { %2797 = vrot.lane.b32.xlu0 %v4407_v2, %s4043_s20 }
 0x30f   : > { %2629 = vrot.lane.b32.xlu1 %v1980_v1, %s4041_s18 }
 0x310   : > { %1988 = vrot.lane.b32.xlu0 %v1981_v3, %s4038_s30  ;;  %s4049_s30 = smov [#allocation3]  }
 0x313   : > { %2795 = vrot.lane.b32.xlu1 %v1980_v1, %s4043_s20 }
 0x314   : > { %2961 = vrot.lane.b32.xlu0 %v1980_v1, %s4044_s21 }
 0x317   : > { %2963 = vrot.lane.b32.xlu1 %v4407_v2, %s4044_s21 }
 0x318   : > { %2301 = vrot.lane.b32.xlu0 %v1981_v3, %s4039_s11  ;;  %s3977_s11 = sshll.u32 %s4049_s30, 4  ;;  %s3978_s11 = int_to_ptr.vmem [resolvable:$false] %s3977_s11 }
 0x31b   : > { %3127 = vrot.lane.b32.xlu1 %v1980_v1, %s4664_s29 }
 0x31c   : > { %2959 = vrot.lane.b32.xlu0 %v1973_v63, %s4044_s21 }
 0x31f   : > { %2467 = vrot.lane.b32.xlu1 %v1981_v3, %s4040_s12  ;;  %s350_s12 = sand.u32 1, %s4027_s14  }
 0x320   : > { %3129 = vrot.lane.b32.xlu0 %v4407_v2, %s4664_s29 }
 0x323   : > { %2633 = vrot.lane.b32.xlu1 %v1981_v3, %s4041_s18  ;;  %s3899_s18 = smul.u32 12, %s350_s12 }
 0x324   : > { %2799 = vrot.lane.b32.xlu0 %v1981_v3, %s4043_s20  ;;  %s3900_s20 = smul.u32 192, %s4126_s17  ;;  %s3546_s17 = scalar_lea.sflag [#allocation4], %s350_s12 }
 0x326   : > { %s4605_s28 = scalar_lea.hbm %s4657_s10, %s3900_s20 }
 0x327   : > { %3125 = vrot.lane.b32.xlu1 %v1973_v63, %s4664_s29 }
 0x328   : > { %2965 = vrot.lane.b32.xlu0 %v1981_v3, %s4044_s21  ;;  %s352_s21 = scalar_lea.vmem [#allocation3], %s3899_s18  ;;  %s3979_s18 = scalar_lea.vmem %s3978_s11, 384 }
 0x32b   : > { %3295 = vrot.lane.b32.xlu1 %v4407_v2, %s4046_s26 }
 0x32c   : > { %3293 = vrot.lane.b32.xlu0 %v1980_v1, %s4046_s26 }
 0x32f   : > { %3131 = vrot.lane.b32.xlu1 %v1981_v3, %s4664_s29 }
 0x330   : > { %3291 = vrot.lane.b32.xlu0 %v1973_v63, %s4046_s26 }
 0x333   : > { %3297 = vrot.lane.b32.xlu1 %v1981_v3, %s4046_s26  ;;  %s3560_s26 = sshll.u32 %s352_s21, 4  ;;  %s4607_s26 = int_to_ptr.vmem [resolvable:$true] %s3560_s26 }
 0x334   : > { %3458 = vperm.xlu0 %3952, %v3455_v4   ;;  %s3973_s29 = scalar_lea.vmem %s4607_s26, 192  ;;  %p3980_p0 = scmp.lt.s32.totalorder %s4607_s26, %s3978_s11 }
 0x335   : > { %p3974_p11 = scmp.ne.s32.totalorder %s4607_s26, %s3973_s29  ;;  %p3981_p1 = scmp.lt.s32.totalorder %s3979_s18, %s3973_s29 }
 0x337   : > { %p3975_p12 = pnand %p3974_p11, %p4143_p5  ;;  %p3982_p2 = por %p3981_p1, %p3980_p0 }
 0x339   : > { %p3976_p13 = pneg %p3975_p12 }
 0x33b   : > { %p3983_p3 = pnand %p3982_p2, %p3976_p13 }
 0x366   : > { %v1985_v5 = vpop.permute.xlu0 %1984 }
 0x369   : > { %v1987_v6 = vpop.permute.xlu1 %1986 }
 0x36a   : > { %v1991_v7 = vsel %vm378_vm1, %v1985_v5, %v1987_v6  ;;  %v1983_v8 = vpop.permute.xlu0 %1982 }
 0x36b   : > { %v1990_v10 = vsel %vm378_vm1, %v1983_v8, %v1985_v5  ;;  %3682 = vmatprep.subr.msk.mxu0 %vm386_vm2, %v1991_v7 }
 0x36c   : > { %3683 = vmatpush1.msk.msra.mxu0 %vm386_vm2, %v1990_v10 }
 0x36d   : > { %3684 = vmatmul.mubr.msk.f32.vlgmr.msra.gmra.mrb[2].mxu0 %vm382_vm3, %v3681_v9  ;;  %3687 = vmatprep.subr.msk.mxu0 %vm386_vm2, %v1980_v1  ;;  %v2296_v11 = vpop.permute.xlu1 %2295 }
 0x36e   : > { %v2300_v12 = vpop.permute.xlu0 %2299  ;;  %3688 = vmatpush1.msk.msra.mxu0 %vm386_vm2, %v1973_v63  ;;  %2216 = vmatprep.mubr.f32.mxu0 %v4037_v0 }
 0x371   : > { %v2298_v13 = vpop.permute.xlu1 %2297 }
 0x372   : > { %v2304_v14 = vsel %vm694_vm4, %v2298_v13, %v2300_v12  ;;  %v2462_v15 = vpop.permute.xlu0 %2461  ;;  %v2303_v17 = vsel %vm694_vm4, %v2296_v11, %v2298_v13  ;;  %v3728_v11 = vld [vmem:[%s4653_s6 + $0x20] sm:$0xf] }
 0x373   : > { %3693 = vmatprep.subr.msk.mxu0 %vm386_vm2, %v2304_v14 }
 0x375   : > { %3689 = vmatmul.mubr.msk.f32.vlgmr.msra.gmra.mrb[2].mxu0 %vm382_vm3, %v1975_v16  ;;  %v2466_v18 = vpop.permute.xlu1 %2465 }
 0x376   : > { %3694 = vmatpush1.msk.msra.mxu0 %vm386_vm2, %v2303_v17  ;;  %v2464_v19 = vpop.permute.xlu0 %2463  ;;  %2379 = vmatprep.mubr.f32.mxu0 %v4037_v0 }
 0x377   : > { %v2470_v20 = vsel %vm861_vm5, %v2464_v19, %v2466_v18  ;;  %v2469_v24 = vsel %vm861_vm5, %v2462_v15, %v2464_v19 }
 0x378   : > { %3699 = vmatprep.subr.msk.mxu0 %vm386_vm2, %v2470_v20 }
 0x379   : > { %v2628_v21 = vpop.permute.xlu1 %2627 }
 0x37a   : > { %v2632_v22 = vpop.permute.xlu0 %2631 }
 0x37d   : > { %3695 = vmatmul.mubr.msk.f32.vlgmr.msra.gmra.mrb[2].mxu0 %vm382_vm3, %v3692_v23  ;;  %v2794_v25 = vpop.permute.xlu1 %2793 }
 0x37e   : > { %3700 = vmatpush1.msk.msra.mxu0 %vm386_vm2, %v2469_v24  ;;  %v2798_v26 = vpop.permute.xlu0 %2797  ;;  %2545 = vmatprep.mubr.f32.mxu0 %v4037_v0 }
 0x381   : > { %v2630_v27 = vpop.permute.xlu1 %2629 }
 0x382   : > { %v2636_v28 = vsel %vm1028_vm6, %v2630_v27, %v2632_v22  ;;  %v1989_v30 = vpop.permute.xlu0 %1988  ;;  %v2635_v33 = vsel %vm1028_vm6, %v2628_v21, %v2630_v27 }
 0x383   : > { %v1992_v32 = vsel %vm378_vm1, %v1987_v6, %v1989_v30  ;;  %3705 = vmatprep.subr.msk.mxu0 %vm386_vm2, %v2636_v28  ;;  %vm4665_vm1 = vcmask 744448   ;;  %v3722_v6 = vld [vmem:[%s4653_s6 + $0x1c] sm:$0xf] }
 0x384   : > { %3823 = vmatpush3.msk.msra.mxu1 %vm386_vm2, %v1992_v32 }
 0x385   : > { %3701 = vmatmul.mubr.msk.f32.vlgmr.msra.gmra.mrb[2].mxu0 %vm382_vm3, %v3698_v31  ;;  %v2796_v34 = vpop.permute.xlu1 %2795  ;;  %3827 = vmatprep.subr.mxu1 %v4037_v0 }
 0x386   : > { %3706 = vmatpush1.msk.msra.mxu0 %vm386_vm2, %v2635_v33  ;;  %v2802_v35 = vsel %vm1195_vm7, %v2796_v34, %v2798_v26  ;;  %3825 = vmatmul.mubr.msk.f32.vlgmr.msra.gmra.mrb[18].mxu1 %vm382_vm3, %v3681_v9  ;;  %v2962_v36 = vpop.permute.xlu0 %2961  ;;  %v2801_v42 = vsel %vm1195_vm7, %v2794_v25, %v2796_v34 }
 0x387   : > { %3828 = vmatpush3.msk.msra.mxu1 %vm386_vm2, %v4407_v2  ;;  %3711 = vmatprep.subr.msk.mxu0 %vm386_vm2, %v2802_v35 }
 0x388   : > { %3829 = vmatprep.mubr.msk.f32.mxu1 %vm4042_vm0, %v4037_v0  ;;  %3832 = vmatprep.subr.mxu1 %v4037_v0 }
 0x389   : > { %v2964_v38 = vpop.permute.xlu1 %2963  ;;  %2711 = vmatprep.mubr.f32.mxu0 %v4037_v0 }
 0x38a   : > { %v2302_v39 = vpop.permute.xlu0 %2301  ;;  %3830 = vmatmul.mubr.msk.f32.vlgmr.msra.gmra.mrb[20].mxu1 %vm382_vm3, %v1975_v16  ;;  %v2968_v44 = vsel %vm1362_vm8, %v2962_v36, %v2964_v38 }
 0x38b   : > { %v2305_v41 = vsel %vm694_vm4, %v2300_v12, %v2302_v39  ;;  %3834 = vmatprep.mubr.msk.f32.mxu1 %vm4042_vm0, %v4037_v0  ;;  %vm4666_vm4 = vmmov %vm4665_vm1 }
 0x38c   : > { %3833 = vmatpush3.msk.msra.mxu1 %vm386_vm2, %v2305_v41 }
 0x38d   : > { %3707 = vmatmul.mubr.msk.f32.vlgmr.msra.gmra.mrb[2].mxu0 %vm382_vm3, %v3704_v40  ;;  %v3128_v43 = vpop.permute.xlu1 %3127  ;;  %3837 = vmatprep.subr.mxu1 %v4037_v0 }
 0x38e   : > { %3712 = vmatpush1.msk.msra.mxu0 %vm386_vm2, %v2801_v42  ;;  %v2960_v48 = vpop.permute.xlu0 %2959  ;;  %3835 = vmatmul.mubr.msk.f32.vlgmr.msra.gmra.mrb[22].mxu1 %vm382_vm3, %v3692_v23 }
 0x38f   : > { %3717 = vmatprep.subr.msk.mxu0 %vm386_vm2, %v2968_v44  ;;  %3839 = vmatprep.mubr.msk.f32.mxu1 %vm4042_vm0, %v4037_v0  ;;  %v2967_v54 = vsel %vm1362_vm8, %v2960_v48, %v2962_v36 }
 0x390   : > { %2877 = vmatprep.mubr.f32.mxu0 %v4037_v0 }
 0x391   : > { %v2468_v50 = vpop.permute.xlu1 %2467 }
 0x392   : > { %v2471_v51 = vsel %vm861_vm5, %v2466_v18, %v2468_v50  ;;  %v3130_v52 = vpop.permute.xlu0 %3129  ;;  %vm4667_vm5 = vcmask 736256  }
 0x393   : > { %3838 = vmatpush3.msk.msra.mxu1 %vm386_vm2, %v2471_v51  ;;  %v3134_v56 = vsel %vm4665_vm1, %v3128_v43, %v3130_v52 }
 0x394   : > { %3840 = vmatmul.mubr.msk.f32.vlgmr.msra.gmra.mrb[24].mxu1 %vm382_vm3, %v3698_v31  ;;  %3842 = vmatprep.subr.mxu1 %v4037_v0 }
 0x395   : > { %3713 = vmatmul.mubr.msk.f32.vlgmr.msra.gmra.mrb[2].mxu0 %vm382_vm3, %v3710_v53  ;;  %v2634_v55 = vpop.permute.xlu1 %2633  ;;  %3844 = vmatprep.mubr.msk.f32.mxu1 %vm4042_vm0, %v4037_v0 }
 0x396   : > { %v2637_v57 = vsel %vm1028_vm6, %v2632_v22, %v2634_v55  ;;  %3718 = vmatpush1.msk.msra.mxu0 %vm386_vm2, %v2967_v54  ;;  %v2800_v58 = vpop.permute.xlu0 %2799  ;;  %3043 = vmatprep.mubr.f32.mxu0 %v4037_v0  ;;  %vm4668_vm6 = vmmov %vm4665_vm1 }
 0x397   : > { %3723 = vmatprep.subr.msk.mxu0 %vm386_vm2, %v3134_v56  ;;  %v2803_v59 = vsel %vm1195_vm7, %v2798_v26, %v2800_v58  ;;  %3843 = vmatpush3.msk.msra.mxu1 %vm386_vm2, %v2637_v57  ;;  %vm4669_vm7 = vmmov %vm4667_vm5 }
 0x398   : > { %3845 = vmatmul.mubr.msk.f32.vlgmr.msra.gmra.mrb[26].mxu1 %vm382_vm3, %v3704_v40  ;;  %3847 = vmatprep.subr.mxu1 %v4037_v0 }
 0x399   : > { %v3126_v60 = vpop.permute.xlu1 %3125  ;;  %3848 = vmatpush3.msk.msra.mxu1 %vm386_vm2, %v2803_v59  ;;  %3849 = vmatprep.mubr.msk.f32.mxu1 %vm4042_vm0, %v4037_v0 }
 0x39a   : > { %v2966_v61 = vpop.permute.xlu0 %2965  ;;  %3852 = vmatprep.subr.mxu1 %v4037_v0  ;;  %v3133_v1 = vsel %vm4666_vm4, %v3126_v60, %v3128_v43 }
 0x39b   : > { %v2969_v63 = vsel %vm1362_vm8, %v2964_v38, %v2966_v61  ;;  %vm4670_vm8 = vmmov %vm4667_vm5 }
 0x39c   : > { %3850 = vmatmul.mubr.msk.f32.vlgmr.msra.gmra.mrb[28].mxu1 %vm382_vm3, %v3710_v53 }
 0x39d   : > { %3853 = vmatpush3.msk.msra.mxu1 %vm386_vm2, %v2969_v63  ;;  %v3296_v2 = vpop.permute.xlu1 %3295  ;;  %3719 = vmatmul.mubr.msk.f32.vlgmr.msra.gmra.mrb[2].mxu0 %vm382_vm3, %v3716_v62  ;;  %v3465_v63 = vld [vmem:[%s4656_s9] sm:$0xf] }
 0x39e   : > { %3724 = vmatpush1.msk.msra.mxu0 %vm386_vm2, %v3133_v1  ;;  %v3294_v3 = vpop.permute.xlu0 %3293  ;;  %3854 = vmatprep.mubr.msk.f32.mxu1 %vm4042_vm0, %v4037_v0  ;;  %v3464_v1 = vld [vmem:[%s4655_s8] sm:$0xf] }
 0x39f   : > { %v3300_v4 = vsel %vm4667_vm5, %v3294_v3, %v3296_v2  ;;  %3857 = vmatprep.subr.mxu1 %v4037_v0  ;;  %3209 = vmatprep.mubr.f32.mxu0 %v4037_v0 }
 0x3a0   : > { %3855 = vmatmul.mubr.msk.f32.vlgmr.msra.gmra.mrb[30].mxu1 %vm382_vm3, %v3716_v62  ;;  %3729 = vmatprep.subr.msk.mxu0 %vm386_vm2, %v3300_v4 }
 0x3a1   : > { %v3132_v5 = vpop.permute.xlu1 %3131  ;;  %3859 = vmatprep.mubr.msk.f32.mxu1 %vm4042_vm0, %v4037_v0 }
 0x3a2   : > { %v3135_v7 = vsel %vm4668_vm6, %v3130_v52, %v3132_v5  ;;  %v3292_v8 = vpop.permute.xlu0 %3291 }
 0x3a3   : > { %v3299_v9 = vsel %vm4669_vm7, %v3292_v8, %v3294_v3  ;;  %3858 = vmatpush3.msk.msra.mxu1 %vm386_vm2, %v3135_v7 }
 0x3a4   : > { %3860 = vmatmul.mubr.msk.f32.vlgmr.msra.gmra.mrb[32].mxu1 %vm382_vm3, %v3722_v6  ;;  %3862 = vmatprep.subr.mxu1 %v4037_v0 }
 0x3a5   : > { %v3298_v10 = vpop.permute.xlu1 %3297  ;;  %3725 = vmatmul.mubr.msk.f32.vlgmr.msra.gmra.mrb[2].mxu0 %vm382_vm3, %v3722_v6  ;;  %3864 = vmatprep.mubr.msk.f32.mxu1 %vm4042_vm0, %v4037_v0 }
 0x3a6   : > { %v3301_v12 = vsel %vm4670_vm8, %v3296_v2, %v3298_v10  ;;  %3730 = vmatpush1.msk.msra.mxu0 %vm386_vm2, %v3299_v9  ;;  %3375 = vmatprep.mubr.f32.mxu0 %v4037_v0 }
 0x3a7   : > { %3863 = vmatpush3.msk.msra.mxu1 %vm386_vm2, %v3301_v12 }
 0x3a8   : > { %3865 = vmatmul.mubr.msk.f32.vlgmr.msra.gmra.mrb[34].mxu1 %vm382_vm3, %v3728_v11 }
 0x3ad   : > { %3731 = vmatmul.mubr.msk.f32.vlgmr.msra.gmra.mrb[2].mxu0 %vm382_vm3, %v3728_v11 }
 0x3b3   : > { %v3459_v40 = vpop.permute.xlu0 %3458 }
 0x459   : > { %v2139_v13 = vpop.f32.mrb[18].mxu1 }
 0x45a   : > { %v3826_v14 = vpop.f32.mrb[19].mxu1 }
 0x45d   : > { %v2289_v15 = vpop.f32.mrb[20].mxu1 }
 0x45e   : > { %v2290_v16 = vadd.f32 %v2289_v15, %v2139_v13  ;;  %v3831_v17 = vpop.f32.mrb[21].mxu1 }
 0x461   : > { %v2452_v18 = vpop.f32.mrb[22].mxu1 }
 0x462   : > { %v2458_v19 = vadd.f32 %v2452_v18, %v2290_v16  ;;  %v3836_v20 = vpop.f32.mrb[23].mxu1 }
 0x467   : > { %v2618_v21 = vpop.f32.mrb[24].mxu1 }
 0x468   : > { %v2624_v22 = vadd.f32 %v2618_v21, %v2458_v19  ;;  %v3841_v23 = vpop.f32.mrb[25].mxu1 }
 0x46b   : > { %v2784_v24 = vpop.f32.mrb[26].mxu1 }
 0x46c   : > { %v2790_v25 = vadd.f32 %v2784_v24, %v2624_v22  ;;  %v3846_v0 = vpop.f32.mrb[27].mxu1 }
 0x46f   : > { %v2950_v26 = vpop.f32.mrb[28].mxu1 }
 0x470   : > { %v2956_v27 = vadd.f32 %v2950_v26, %v2790_v25  ;;  %v3851_v28 = vpop.f32.mrb[29].mxu1 }
 0x473   : > { %v3116_v30 = vpop.f32.mrb[30].mxu1 }
 0x474   : > { %v3122_v31 = vadd.f32 %v3116_v30, %v2956_v27  ;;  %v3856_v32 = vpop.f32.mrb[31].mxu1 }
 0x477   : > { %v3282_v33 = vpop.f32.mrb[32].mxu1 }
 0x478   : > { %v3288_v34 = vadd.f32 %v3282_v33, %v3122_v31  ;;  %v3861_v35 = vpop.f32.mrb[33].mxu1 }
 0x47b   : > { %v3448_v36 = vpop.f32.mrb[34].mxu1 }
 0x47c   : > { %v3454_v38 = vadd.f32 %v3448_v36, %v3288_v34  ;;  %v3866_v39 = vpop.f32.mrb[35].mxu1 }
 0x47e   : > { %v3463_v41 = vadd.f32 %v3459_v40, %v3454_v38 }
 0x480   : > { %v3377_v42 = vpop.f32.mrb[2].mxu0  ;;  %v3468_v50 = vmul.f32 %v3463_v41, %v4380_v45 }
 0x481   : > { %v3461_v43 = vadd.f32 %v3459_v40, %v3377_v42  ;;  %v3379_v44 = vpop.f32.mrb[3].mxu0 }
 0x482   : > { %v3462_v48 = vadd.f32 %v3459_v40, %v3379_v44  ;;  %v3478_v57 = vmul.f32 %v3468_v50, %v3468_v50  ;;  %v3472_v60 = vsel %vm386_vm2, %v3468_v50, 0.0 }
 0x483   : > { %v3466_v51 = vmul.f32 %v3461_v43, %v4382_v47 }
 0x484   : > { %v3467_v52 = vmul.f32 %v3462_v48, %v4384_v49  ;;  %v3482_v47 = vsel %vm386_vm2, %v3478_v57, 0.0 }
 0x485   : > { %v3476_v53 = vmul.f32 %v3466_v51, %v3466_v51  ;;  %v3469_v54 = vsel %vm386_vm2, %v3466_v51, 0.0 }
 0x486   : > { %v3477_v55 = vmul.f32 %v3467_v52, %v3467_v52  ;;  %v3470_v56 = vsel %vm386_vm2, %v3467_v52, 0.0 }
 0x487   : > { %v3471_v58 = vadd.f32 %v3470_v56, %v3469_v54  ;;  %v3479_v59 = vsel %vm386_vm2, %v3476_v53, 0.0 }
 0x488   : > { %v3480_v61 = vsel %vm386_vm2, %v3477_v55, 0.0 }
 0x489   : > { %v3473_v62 = vadd.f32 %v3472_v60, %v3471_v58  ;;  %v3481_v45 = vadd.f32 %v3480_v61, %v3479_v59 }
 0x48b   : > { %3474 = vadd.xlane.f32.xlu1 %v3473_v62  ;;  %v3483_v49 = vadd.f32 %v3482_v47, %v3481_v45 }
 0x48d   : > { %3484 = vadd.xlane.f32.xlu0 %v3483_v49 }
 0x49c   : > { %3509 = vperm.xlu1 %3953, %v3465_v63  }
 0x4a3   : > { %3501 = vperm.xlu0 %3952, %v3464_v1  }
 0x518   : > { %v3475_v2 = vpop.xlane.xlu1 %3474 }
 0x519   : > { %v3486_v3 = vmul.f32 0.00390625, %v3475_v2 }
 0x51a   : > { %v3485_v4 = vpop.xlane.xlu0 %3484 }
 0x51b   : > { %v3487_v5 = vmul.f32 0.00390625, %v3485_v4  ;;  %v3488_v6 = vmul.f32 %v3486_v3, %v3486_v3  ;;  %v3491_v10 = vsub.f32 %v3461_v43, %v3486_v3  ;;  %v3492_v11 = vsub.f32 %v3462_v48, %v3486_v3 }
 0x51c   : > { %v3493_v12 = vsub.f32 %v3463_v41, %v3486_v3  ;;  %v3510_v21 = vpop.permute.xlu1 %3509 }
 0x51d   : > { %v3489_v7 = vsub.f32 %v3487_v5, %v3488_v6 }
 0x51f   : > { %v3490_v8 = vmax.f32 %v3489_v7, 0.0 }
 0x521   : > { %v3494_v9 = vadd.f32 1e-05, %v3490_v8 }
 0x522   : > { %v3502_v17 = vpop.permute.xlu0 %3501 }
 0x523   : > { %3965 = vrsqrt.f32 %v3494_v9 }
 0x52d   : > { %v3966_v13 = vpop.eup %3965 }
 0x52e   : > { %v3496_v14 = vmul.f32 %v3966_v13, %v3491_v10  ;;  %v3497_v15 = vmul.f32 %v3966_v13, %v3492_v11  ;;  %v3498_v16 = vmul.f32 %v3966_v13, %v3493_v12 }
 0x530   : > { %v3504_v18 = vmul.f32 %v3502_v17, %v3496_v14  ;;  %v3505_v19 = vmul.f32 %v3502_v17, %v3497_v15  ;;  %v3506_v20 = vmul.f32 %v3502_v17, %v3498_v16 }
 0x532   : > { %v3512_v22 = vadd.f32 %v3510_v21, %v3504_v18  ;;  %v3513_v23 = vadd.f32 %v3510_v21, %v3505_v19  ;;  %v3514_v24 = vadd.f32 %v3510_v21, %v3506_v20 }
 0x534   : > { %v3518_v25 = vadd.f32 %v3512_v22, %v4284_v37  ;;  %v3519_v0 = vadd.f32 %v3513_v23, %v4262_v29  ;;  %v3520_v26 = vadd.f32 %v3514_v24, %v4307_v46 }
 0x536   : > { %v3524_v27 = vmin.f32 %v3518_v25, 0.0  ;;  %v3525_v28 = vmin.f32 %v3519_v0, 0.0  ;;  %v3526_v30 = vmin.f32 %v3520_v26, 0.0  ;;  %vm3521_vm0 = vcmp.gt.f32.partialorder %v3518_v25, 0.0 }
 0x537   : > { %vm3522_vm2 = vcmp.gt.f32.partialorder %v3519_v0, 0.0  ;;  %vm3523_vm3 = vcmp.gt.f32.partialorder %v3520_v26, 0.0 }
 0x538   : > { %v3527_v31 = vmul.f32 1.442695, %v3524_v27  ;;  %v3529_v32 = vmul.f32 1.442695, %v3525_v28  ;;  %v3531_v33 = vmul.f32 1.442695, %v3526_v30 }
 0x53a   : > { %3967 = vpow2.f32 %v3527_v31 }
 0x53b   : > { %3969 = vpow2.f32 %v3529_v32 }
 0x53c   : > { %3971 = vpow2.f32 %v3531_v33 }
 0x544   : > { %v3968_v34 = vpop.eup %3967 }
 0x545   : > { %v3970_v35 = vpop.eup %3969  ;;  %v3734_v36 = vadd.f32 -1.0, %v3968_v34 }
 0x546   : > { %v3972_v37 = vpop.eup %3971  ;;  %v3735_v29 = vadd.f32 -1.0, %v3970_v35 }
 0x547   : > { %v3736_v46 = vadd.f32 -1.0, %v3972_v37  ;;  %v3536_v38 = vsel %vm3521_vm0, %v3518_v25, %v3734_v36 }
 0x548   : > { %v3537_v39 = vsel %vm3522_vm2, %v3519_v0, %v3735_v29 }
 0x549   : > { %v3538_v40 = vsel %vm3523_vm3, %v3520_v26, %v3736_v46  ;;  %v3541_v41 = vcombine.low %v3536_v38, %v3537_v39 }
 0x54a   : > { %3544 = vst [vmem:[%s352_s21 + $0x8] sm:$0xf] %v3538_v40 }
 0x54b   : > { %3543 = vst [vmem:[%s352_s21] sm:$0xff] %v3541_v41 }
 0x54c   : > { %3986 = shalt.err (!%p3983_p3)
}
 0x54d   : > { %s3987_s12 = scalar_lea.hbm %s4605_s28, 192  ;;  %s3991_s25 = scalar_lea.hbm %s4657_s10, 384 }
 0x54e   : > { %p3988_p4 = scmp.ne.s32.totalorder %s4605_s28, %s3987_s12  ;;  %p3992_p9 = scmp.lt.u32.totalorder %s4605_s28, %s4657_s10 }
 0x54f   : > { %p3993_p10 = scmp.lt.u32.totalorder %s3991_s25, %s3987_s12  ;;  %p3995_p12 = scmp.lt.u32.totalorder %s3987_s12, %s4605_s28 }
 0x550   : > { %p3989_p7 = pnand %p3988_p4, %p4143_p5 }
 0x551   : > { %p3994_p11 = por %p3993_p10, %p3992_p9 }
 0x552   : > { %p3990_p8 = pneg %p3989_p7 }
 0x553   : > { %p3996_p13 = por %p3995_p12, %p3994_p11 }
 0x555   : > { %p3997_p0 = pnand %p3996_p13, %p3990_p8 }
 0x557   : > { %4000 = shalt.err (!%p3997_p0)
}
 0x558   : > { %3901 = dma.vmem_to_hbm [thread:$0]  (%p4143_p5), %s4607_s26, 192, %s4605_s28, %s3546_s17  }
 0x559 PF: > { %p3907_p1 = scmp.ge.s32.totalorder %s4035_s16, 2  ;;  %s3572_s29 = sand.u32 1, %s4023_s13  }
 0x55a   : > { %s3573_s11 = scalar_lea.sflag [#allocation4], %s3572_s29 }
 0x55b   : > { %p3904_p2 = pnand %p3907_p1, %p4147_p6 }
 0x55d   : > { %4018 = dma.done.wait (!%p3904_p2), %s3573_s11, 192  }
 0x55e   : > { %4020 = vsyncadd (!%p3904_p2), %s3573_s11, 4294967104  ;;  %p20_p3 = scmp.ge.s32.totalorder %s4130_s19, 4   ;;  %s4671_s13 = smov %s4027_s14 }
 0x55f   : > { %s4672_s14 = smov %s4031_s15  ;;  %s4673_s15 = smov %s4141_s22 }
 0x560   : > { %s4674_s16 = smov %s4130_s19  ;;  %22 = sbr.rel (!%p20_p3) target bundleno = 3 (0x3), region = 111 }
 0x567   :  { %3578 = vsyncpa [#allocation4], 1 }
 0x568   :  { %3580 = vsyncpa [#allocation4 + $0x1], 1 }

</bundles_post_ra>
